<compile_context>
chip_gen: v7x
topology: tpu7x:2x2x1
jax: 0.10.0
libtpu: 0.0.40
codegen_flags: <defaults>
</compile_context>

<pallas_src>
import math
import functools

import jax
import jax.numpy as jnp
from jax.experimental import pallas as pl
from jax.experimental.pallas import tpu as pltpu


# ----------------------------------------------------------------------------
# Kernel: one batch tile per grid step. Fused QKV projections, per-head batched
# scaled dot-product attention with masking + softmax (weights stored per head),
# single fused output projection over all heads.
# ----------------------------------------------------------------------------
def _mha_kernel(key_ref, value_ref, query_ref, mask_ref,
                wk_ref, bk_ref, wv_ref, bv_ref, wq_ref, bq_ref, wo_ref, bo_ref,
                cvec_ref, attw_ref,
                *, num_heads, head_dim, inv_scale, neg_inf,
                use_bf16, bf16_scores, approx_recip):
    bt, klen, key_dim = key_ref.shape
    qlen = query_ref.shape[1]
    query_dim = query_ref.shape[2]
    att_dim = num_heads * head_dim
    out_dim = wo_ref.shape[1]

    mm_dt = jnp.bfloat16 if use_bf16 else jnp.float32
    score_dt = jnp.bfloat16 if (use_bf16 and bf16_scores) else jnp.float32

    # Hoisted weight casts: once per grid step (not per matmul / per head).
    wk = wk_ref[...].astype(mm_dt)
    wv = wv_ref[...].astype(mm_dt)
    wq = wq_ref[...].astype(mm_dt)
    wo = wo_ref[...].astype(mm_dt)

    def mm(x, w):
        return jnp.dot(x.astype(mm_dt), w, preferred_element_type=jnp.float32)

    # ---- fused QKV projections: flatten (batch_tile, seq) rows to fill the MXU M dim ----
    k2 = mm(key_ref[...].reshape(bt * klen, key_dim), wk) + bk_ref[...]
    v2 = mm(value_ref[...].reshape(bt * klen, key_dim), wv) + bv_ref[...]
    # fold 1/sqrt(head_dim) into q once instead of scaling every [qlen, klen] score tile
    q2 = (mm(query_ref[...].reshape(bt * qlen, query_dim), wq) + bq_ref[...]) * inv_scale

    k3 = k2.reshape(bt, klen, att_dim)
    v3 = v2.reshape(bt, klen, att_dim)
    q3 = q2.reshape(bt, qlen, att_dim)

    mask_zero = mask_ref[...] == 0            # [bt, qlen, klen]; hoisted out of the head loop

    ctx_heads = []
    for h in range(num_heads):                # static unroll; head slices are lane-dim slices
        sl = slice(h * head_dim, (h + 1) * head_dim)
        qh = q3[:, :, sl].astype(score_dt)    # [bt, qlen, hd]
        kh = k3[:, :, sl].astype(score_dt)    # [bt, klen, hd]

        # scores: contract head_dim directly (no kh.T), batched over the batch tile
        s = jnp.einsum('bqd,bkd->bqk', qh, kh,
                       preferred_element_type=jnp.float32)       # [bt, qlen, klen]
        s = jnp.where(mask_zero, neg_inf, s)                     # masked_fill(mask==0, neg_inf)

        # softmax over klen (torch dim=2)
        s_max = jnp.max(s, axis=-1, keepdims=True)
        p = jnp.exp(s - s_max)
        denom = jnp.sum(p, axis=-1, keepdims=True)
        aw = p * pl.reciprocal(denom, approx=approx_recip)       # [bt, qlen, klen]

        # dropout_attn is identity in eval / p = 0.0.

        # Store this head's weights immediately (leading-axis store): nothing is held
        # live until the end of the loop, so vreg/VMEM pressure stays O(1 head).
        attw_ref[:, h] = aw

        # Per-head context (H x smaller than aw); kept only for the fused output proj.
        ctx_heads.append(
            jnp.einsum('bqk,bkd->bqd', aw.astype(mm_dt), v3[:, :, sl].astype(mm_dt),
                       preferred_element_type=jnp.float32))      # [bt, qlen, hd]

    # Single output projection with K = att_dim: concat heads along the lane dim
    # (layout-natural, no transposes) and run ONE MXU matmul instead of H.
    ctx_all = jnp.concatenate(ctx_heads, axis=-1).reshape(bt * qlen, att_dim)
    cvec = mm(ctx_all, wo) + bo_ref[...]
    cvec_ref[...] = cvec.reshape(bt, qlen, out_dim)


# ----------------------------------------------------------------------------
# VMEM-aware batch-tile picker.
# ----------------------------------------------------------------------------
def _pick_batch_tile(n, qlen, klen, num_heads, key_dim, query_dim, att_dim, out_dim,
                     *, mask_itemsize=4, target_rows=512,
                     vmem_budget_bytes=24 * 1024 * 1024):
    """Largest divisor of n such that the double-buffered IO blocks plus live f32
    intermediates (per batch element) plus double-buffered weights fit the VMEM budget
    (sized for v7x's 64 MiB per-core VMEM), while the projection matmuls still see a
    well-filled MXU M dimension (t*qlen <= target_rows). Prefers >= 2 grid steps so the
    'parallel' axis can be sharded across v7x's two TensorCores."""
    io_bytes = 4 * 2 * (2 * klen * key_dim              # key + value blocks (dbl-buffered)
                        + qlen * query_dim)             # query block
    io_bytes += 2 * mask_itemsize * qlen * klen         # mask block
    io_bytes += 4 * 2 * (qlen * out_dim                 # cvec block
                         + num_heads * qlen * klen)     # attw block
    live_bytes = 4 * ((2 * klen + qlen) * att_dim       # k/v/q projections
                      + 3 * qlen * klen                 # s / p / aw for one head
                      + qlen * att_dim)                 # concatenated context
    per_elem = io_bytes + live_bytes
    weight_bytes = 4 * 2 * (2 * key_dim * att_dim + query_dim * att_dim
                            + att_dim * out_dim + 3 * att_dim + out_dim)
    budget = max(vmem_budget_bytes - weight_bytes, per_elem)

    divisors = [t for t in range(1, n + 1) if n % t == 0]
    feas = [t for t in divisors
            if t * per_elem <= budget and t * qlen <= max(target_rows, qlen)]
    if not feas:
        feas = [1]
    tile = max(feas)
    if n // tile < 2:                       # keep both v7x TensorCores busy when possible
        multi = [t for t in feas if n // t >= 2]
        if multi:
            tile = max(multi)
    return tile


def multihead_attention(key, value, query, mask, params, *, num_heads,
                        use_bf16_matmul=False, bf16_scores=False,
                        approx_recip=True, batch_tile=None,
                        vmem_limit_bytes=32 * 1024 * 1024):
    """Pallas wrapper. Returns (cvec [N,qlen,out_dim], attw [N,H,qlen,klen])."""
    wk_t, bk, wv_t, bv, wq_t, bq, wo_t, bo = params
    N, klen, key_dim = key.shape
    qlen = query.shape[1]
    query_dim = query.shape[2]
    att_dim = wk_t.shape[1]
    out_dim = wo_t.shape[1]
    head_dim = att_dim // num_heads
    inv_scale = 1.0 / math.sqrt(head_dim)
    neg_inf = float(jnp.finfo(jnp.float32).min)   # matches torch's np.finfo(f32).min

    bt = batch_tile if batch_tile is not None else _pick_batch_tile(
        N, qlen, klen, num_heads, key_dim, query_dim, att_dim, out_dim,
        mask_itemsize=jnp.dtype(mask.dtype).itemsize)
    assert N % bt == 0, f"batch tile {bt} must divide batch {N}"
    grid = (N // bt,)

    kernel = functools.partial(
        _mha_kernel, num_heads=num_heads, head_dim=head_dim,
        inv_scale=inv_scale, neg_inf=neg_inf,
        use_bf16=use_bf16_matmul, bf16_scores=bf16_scores,
        approx_recip=approx_recip)

    full2 = lambda i: (0, 0)       # replicated (weight/bias) blocks
    per3 = lambda i: (i, 0, 0)     # per-batch-tile blocks
    per4 = lambda i: (i, 0, 0, 0)

    grid_spec = pltpu.PrefetchScalarGridSpec(
        num_scalar_prefetch=0,
        grid=grid,
        in_specs=[
            pl.BlockSpec((bt, klen, key_dim), per3),        # key
            pl.BlockSpec((bt, klen, key_dim), per3),        # value
            pl.BlockSpec((bt, qlen, query_dim), per3),      # query
            pl.BlockSpec((bt, qlen, klen), per3),           # mask (any dtype; int8 saves HBM BW)
            pl.BlockSpec((key_dim, att_dim), full2),        # Wk^T
            pl.BlockSpec((1, att_dim), full2),              # bk
            pl.BlockSpec((key_dim, att_dim), full2),        # Wv^T
            pl.BlockSpec((1, att_dim), full2),              # bv
            pl.BlockSpec((query_dim, att_dim), full2),      # Wq^T
            pl.BlockSpec((1, att_dim), full2),              # bq
            pl.BlockSpec((att_dim, out_dim), full2),        # Wo^T
            pl.BlockSpec((1, out_dim), full2),              # bo
        ],
        out_specs=[
            pl.BlockSpec((bt, qlen, out_dim), per3),               # cvec
            pl.BlockSpec((bt, num_heads, qlen, klen), per4),       # attw
        ],
    )

    return pl.pallas_call(
        kernel,
        out_shape=(
            jax.ShapeDtypeStruct((N, qlen, out_dim), jnp.float32),
            jax.ShapeDtypeStruct((N, num_heads, qlen, klen), jnp.float32),
        ),
        grid_spec=grid_spec,
        compiler_params=pltpu.CompilerParams(
            dimension_semantics=("parallel",),
            vmem_limit_bytes=vmem_limit_bytes),
    )(key, value, query, mask,
      wk_t, bk, wv_t, bv, wq_t, bq, wo_t, bo)


# ----------------------------------------------------------------------------
# Parameter init (mirrors reset_parameters: Xavier uniform, gain 1/sqrt(2) for
# q/k/v when key_dim == query_dim, gain 1 for w_out; zero biases).
# ----------------------------------------------------------------------------
def xavier_uniform(rng, shape, gain=1.0):
    fan_out, fan_in = shape  # torch Linear weight is [out, in]
    bound = gain * math.sqrt(6.0 / (fan_in + fan_out))
    return jax.random.uniform(rng, shape, jnp.float32, -bound, bound)


def init_params(rng, key_dim, query_dim, att_dim, out_dim):
    qkv_same = key_dim == query_dim
    g = 1.0 / math.sqrt(2.0) if qkv_same else 1.0
    k1, k2, k3, k4 = jax.random.split(rng, 4)
    wk = xavier_uniform(k1, (att_dim, key_dim), g)
    wv = xavier_uniform(k2, (att_dim, key_dim), g)
    wq = xavier_uniform(k3, (att_dim, query_dim), g)
    wo = xavier_uniform(k4, (out_dim, att_dim), 1.0)
    # Transpose to [in, out]; biases as [1, dim] for TPU-friendly 2D layout.
    return (wk.T, jnp.zeros((1, att_dim), jnp.float32),
            wv.T, jnp.zeros((1, att_dim), jnp.float32),
            wq.T, jnp.zeros((1, att_dim), jnp.float32),
            wo.T, jnp.zeros((1, out_dim), jnp.float32))


# Pure-JAX reference mirroring the torch forward (for a correctness check).
def mha_reference(key, value, query, mask, params, *, num_heads):
    wk_t, bk, wv_t, bv, wq_t, bq, wo_t, bo = params
    N, klen, _ = key.shape
    qlen = query.shape[1]
    att_dim = wk_t.shape[1]
    head_dim = att_dim // num_heads
    scale = math.sqrt(head_dim)
    neg_inf = float(jnp.finfo(jnp.float32).min)

    k = (key @ wk_t + bk).reshape(N, klen, num_heads, head_dim)
    v = (value @ wv_t + bv).reshape(N, klen, num_heads, head_dim)
    q = (query @ wq_t + bq).reshape(N, qlen, num_heads, head_dim)
    s = jnp.einsum('bihd,bjhd->bijh', q, k) / scale
    m = jnp.broadcast_to(mask[..., None], (N, qlen, klen, num_heads))
    s = jnp.where(m == 0, neg_inf, s)
    aw = jax.nn.softmax(s, axis=2)
    cvec = jnp.einsum('bijh,bjhd->bihd', aw, v).reshape(N, qlen, att_dim)
    cvec = cvec @ wo_t + bo
    return cvec, jnp.transpose(aw, (0, 3, 1, 2))


if __name__ == "__main__":
    N, qlen, klen = 2, 8, 8
    key_dim = query_dim = 32
    att_dim, out_dim, num_heads = 32, 32, 4

    root = jax.random.PRNGKey(0)
    rk, rv, rq, rp = jax.random.split(root, 4)

    key_in = jax.random.normal(rk, (N, klen, key_dim), jnp.float32)
    value_in = jax.random.normal(rv, (N, klen, key_dim), jnp.float32)
    query_in = jax.random.normal(rq, (N, qlen, query_dim), jnp.float32)
    # mask: 1 = attend, 0 = masked; mask out the last two key positions of batch 1.
    mask = jnp.ones((N, qlen, klen), jnp.float32)
    mask = mask.at[1, :, klen - 2:].set(0.0)

    params = init_params(rp, key_dim, query_dim, att_dim, out_dim)

    # Strict-accuracy settings for the unit check (production: approx_recip=True and
    # use_bf16_matmul=True on v5e/v6e/v7x, optionally bf16_scores=True if attw
    # tolerance allows).
    cvec, attw = multihead_attention(key_in, value_in, query_in, mask, params,
                                     num_heads=num_heads,
                                     use_bf16_matmul=False,
                                     approx_recip=False)
    jax.block_until_ready((cvec, attw))

    cvec_ref, attw_ref = mha_reference(key_in, value_in, query_in, mask, params,
                                       num_heads=num_heads)
    assert cvec.shape == (N, qlen, out_dim)
    assert attw.shape == (N, num_heads, qlen, klen)
    assert jnp.allclose(cvec, cvec_ref, atol=1e-4, rtol=1e-4)
    assert jnp.allclose(attw, attw_ref, atol=2e-5, rtol=1e-4)

    print("KERNEL_OK")
</pallas_src>

<mosaic_0001>
module attributes {stable_mosaic.version = 11 : i64} {
  func.func @_mha_kernel(%arg0: i32, %arg1: memref<1x8x32xf32, #tpu.memory_space<vmem>>, %arg2: memref<1x8x32xf32, #tpu.memory_space<vmem>>, %arg3: memref<1x8x32xf32, #tpu.memory_space<vmem>>, %arg4: memref<1x8x8xf32, #tpu.memory_space<vmem>>, %arg5: memref<32x32xf32, #tpu.memory_space<vmem>>, %arg6: memref<1x32xf32, #tpu.memory_space<vmem>>, %arg7: memref<32x32xf32, #tpu.memory_space<vmem>>, %arg8: memref<1x32xf32, #tpu.memory_space<vmem>>, %arg9: memref<32x32xf32, #tpu.memory_space<vmem>>, %arg10: memref<1x32xf32, #tpu.memory_space<vmem>>, %arg11: memref<32x32xf32, #tpu.memory_space<vmem>>, %arg12: memref<1x32xf32, #tpu.memory_space<vmem>>, %arg13: memref<1x8x32xf32, #tpu.memory_space<vmem>>, %arg14: memref<1x4x8x8xf32, #tpu.memory_space<vmem>>) attributes {dimension_semantics = [#tpu.dimension_semantics<parallel>], iteration_bounds = array<i64: 2>, scalar_prefetch = 0 : i64, scratch_operands = 0 : i64, tpu.core_type = #tpu.core_type<tc>, window_params = [{transform_indices = @transform_0, window_bounds = array<i64: 1, 8, 32>}, {transform_indices = @transform_1, window_bounds = array<i64: 1, 8, 32>}, {transform_indices = @transform_2, window_bounds = array<i64: 1, 8, 32>}, {transform_indices = @transform_3, window_bounds = array<i64: 1, 8, 8>}, {pipeline_mode = #tpu.pipeline_mode<synchronous>, transform_indices = @transform_4, window_bounds = array<i64: 32, 32>}, {pipeline_mode = #tpu.pipeline_mode<synchronous>, transform_indices = @transform_5, window_bounds = array<i64: 1, 32>}, {pipeline_mode = #tpu.pipeline_mode<synchronous>, transform_indices = @transform_6, window_bounds = array<i64: 32, 32>}, {pipeline_mode = #tpu.pipeline_mode<synchronous>, transform_indices = @transform_7, window_bounds = array<i64: 1, 32>}, {pipeline_mode = #tpu.pipeline_mode<synchronous>, transform_indices = @transform_8, window_bounds = array<i64: 32, 32>}, {pipeline_mode = #tpu.pipeline_mode<synchronous>, transform_indices = @transform_9, window_bounds = array<i64: 1, 32>}, {pipeline_mode = #tpu.pipeline_mode<synchronous>, transform_indices = @transform_10, window_bounds = array<i64: 32, 32>}, {pipeline_mode = #tpu.pipeline_mode<synchronous>, transform_indices = @transform_11, window_bounds = array<i64: 1, 32>}, {transform_indices = @transform_12, window_bounds = array<i64: 1, 8, 32>}, {transform_indices = @transform_13, window_bounds = array<i64: 1, 4, 8, 8>}]} {
    %c0 = arith.constant 0 : index
    %c0_0 = arith.constant 0 : index
    %0 = vector.load %arg5[%c0, %c0_0] : memref<32x32xf32, #tpu.memory_space<vmem>>, vector<32x32xf32>
    %c0_1 = arith.constant 0 : index
    %c0_2 = arith.constant 0 : index
    %1 = vector.load %arg7[%c0_1, %c0_2] : memref<32x32xf32, #tpu.memory_space<vmem>>, vector<32x32xf32>
    %c0_3 = arith.constant 0 : index
    %c0_4 = arith.constant 0 : index
    %2 = vector.load %arg9[%c0_3, %c0_4] : memref<32x32xf32, #tpu.memory_space<vmem>>, vector<32x32xf32>
    %c0_5 = arith.constant 0 : index
    %c0_6 = arith.constant 0 : index
    %3 = vector.load %arg11[%c0_5, %c0_6] : memref<32x32xf32, #tpu.memory_space<vmem>>, vector<32x32xf32>
    %c0_7 = arith.constant 0 : index
    %c0_8 = arith.constant 0 : index
    %c0_9 = arith.constant 0 : index
    %4 = vector.load %arg1[%c0_7, %c0_8, %c0_9] : memref<1x8x32xf32, #tpu.memory_space<vmem>>, vector<1x8x32xf32>
    %5 = vector.shape_cast %4 : vector<1x8x32xf32> to vector<8x32xf32>
    %cst = arith.constant dense<0.000000e+00> : vector<8x32xf32>
    %6 = tpu.matmul %5, %0, %cst {dimension_numbers = #tpu.dot_dimension_numbers<[1], [0], [0], [1], [0, 0, 1, 1], [], []>} : vector<8x32xf32>, vector<32x32xf32>, vector<8x32xf32> -> vector<8x32xf32>
    %c0_10 = arith.constant 0 : index
    %c0_11 = arith.constant 0 : index
    %7 = vector.load %arg6[%c0_10, %c0_11] : memref<1x32xf32, #tpu.memory_space<vmem>>, vector<1x32xf32>
    %8 = vector.broadcast %7 : vector<1x32xf32> to vector<8x32xf32>
    %9 = arith.addf %6, %8 : vector<8x32xf32>
    %c0_12 = arith.constant 0 : index
    %c0_13 = arith.constant 0 : index
    %c0_14 = arith.constant 0 : index
    %10 = vector.load %arg2[%c0_12, %c0_13, %c0_14] : memref<1x8x32xf32, #tpu.memory_space<vmem>>, vector<1x8x32xf32>
    %11 = vector.shape_cast %10 : vector<1x8x32xf32> to vector<8x32xf32>
    %cst_15 = arith.constant dense<0.000000e+00> : vector<8x32xf32>
    %12 = tpu.matmul %11, %1, %cst_15 {dimension_numbers = #tpu.dot_dimension_numbers<[1], [0], [0], [1], [0, 0, 1, 1], [], []>} : vector<8x32xf32>, vector<32x32xf32>, vector<8x32xf32> -> vector<8x32xf32>
    %c0_16 = arith.constant 0 : index
    %c0_17 = arith.constant 0 : index
    %13 = vector.load %arg8[%c0_16, %c0_17] : memref<1x32xf32, #tpu.memory_space<vmem>>, vector<1x32xf32>
    %14 = vector.broadcast %13 : vector<1x32xf32> to vector<8x32xf32>
    %15 = arith.addf %12, %14 : vector<8x32xf32>
    %c0_18 = arith.constant 0 : index
    %c0_19 = arith.constant 0 : index
    %c0_20 = arith.constant 0 : index
    %16 = vector.load %arg3[%c0_18, %c0_19, %c0_20] : memref<1x8x32xf32, #tpu.memory_space<vmem>>, vector<1x8x32xf32>
    %17 = vector.shape_cast %16 : vector<1x8x32xf32> to vector<8x32xf32>
    %cst_21 = arith.constant dense<0.000000e+00> : vector<8x32xf32>
    %18 = tpu.matmul %17, %2, %cst_21 {dimension_numbers = #tpu.dot_dimension_numbers<[1], [0], [0], [1], [0, 0, 1, 1], [], []>} : vector<8x32xf32>, vector<32x32xf32>, vector<8x32xf32> -> vector<8x32xf32>
    %c0_22 = arith.constant 0 : index
    %c0_23 = arith.constant 0 : index
    %19 = vector.load %arg10[%c0_22, %c0_23] : memref<1x32xf32, #tpu.memory_space<vmem>>, vector<1x32xf32>
    %20 = vector.broadcast %19 : vector<1x32xf32> to vector<8x32xf32>
    %21 = arith.addf %18, %20 : vector<8x32xf32>
    %cst_24 = arith.constant 0.353553385 : f32
    %22 = vector.broadcast %cst_24 : f32 to vector<8x32xf32>
    %23 = arith.mulf %21, %22 : vector<8x32xf32>
    %24 = vector.shape_cast %9 : vector<8x32xf32> to vector<1x8x32xf32>
    %25 = vector.shape_cast %15 : vector<8x32xf32> to vector<1x8x32xf32>
    %26 = vector.shape_cast %23 : vector<8x32xf32> to vector<1x8x32xf32>
    %c0_25 = arith.constant 0 : index
    %c0_26 = arith.constant 0 : index
    %c0_27 = arith.constant 0 : index
    %27 = vector.load %arg4[%c0_25, %c0_26, %c0_27] : memref<1x8x8xf32, #tpu.memory_space<vmem>>, vector<1x8x8xf32>
    %cst_28 = arith.constant 0.000000e+00 : f32
    %28 = vector.broadcast %cst_28 : f32 to vector<1x8x8xf32>
    %29 = arith.cmpf oeq, %27, %28 : vector<1x8x8xf32>
    %30 = vector.extract_strided_slice %26 {offsets = [0, 0, 0], sizes = [1, 8, 8], strides = [1, 1, 1]} : vector<1x8x32xf32> to vector<1x8x8xf32>
    %31 = vector.extract_strided_slice %24 {offsets = [0, 0, 0], sizes = [1, 8, 8], strides = [1, 1, 1]} : vector<1x8x32xf32> to vector<1x8x8xf32>
    "tpu.trace_start"() <{level = 10 : i32, message = "bqd,bkd->bqk"}> : () -> ()
    %cst_29 = arith.constant dense<0.000000e+00> : vector<1x8x8xf32>
    %32 = tpu.matmul %30, %31, %cst_29 {dimension_numbers = #tpu.dot_dimension_numbers<[2], [2], [1], [1], [0, 0, 0, 1, 1, 1], [0], [0]>} : vector<1x8x8xf32>, vector<1x8x8xf32>, vector<1x8x8xf32> -> vector<1x8x8xf32>
    %cst_30 = arith.constant -3.40282347E+38 : f32
    "tpu.trace_stop"() : () -> ()
    %33 = vector.broadcast %cst_30 : f32 to vector<1x8x8xf32>
    %34 = arith.select %29, %33, %32 : vector<1x8x8xi1>, vector<1x8x8xf32>
    %cst_31 = arith.constant dense<0xFF800000> : vector<1x8xf32>
    %35 = vector.multi_reduction <maximumf>, %34, %cst_31 [2] : vector<1x8x8xf32> to vector<1x8xf32>
    %36 = vector.shape_cast %35 : vector<1x8xf32> to vector<1x8x1xf32>
    %37 = vector.broadcast %36 : vector<1x8x1xf32> to vector<1x8x8xf32>
    %38 = arith.subf %34, %37 : vector<1x8x8xf32>
    %39 = math.exp %38 : vector<1x8x8xf32>
    %cst_32 = arith.constant dense<0.000000e+00> : vector<1x8xf32>
    %40 = vector.multi_reduction <add>, %39, %cst_32 [2] : vector<1x8x8xf32> to vector<1x8xf32>
    %41 = vector.shape_cast %40 : vector<1x8xf32> to vector<1x8x1xf32>
    %42 = tpu.reciprocal %41 : vector<1x8x1xf32> -> vector<1x8x1xf32>
    %43 = vector.broadcast %42 : vector<1x8x1xf32> to vector<1x8x8xf32>
    %44 = arith.mulf %39, %43 : vector<1x8x8xf32>
    %c0_33 = arith.constant 0 : index
    %c0_34 = arith.constant 0 : index
    %c0_35 = arith.constant 0 : index
    %c0_36 = arith.constant 0 : index
    %45 = vector.load %arg14[%c0_33, %c0_34, %c0_35, %c0_36] : memref<1x4x8x8xf32, #tpu.memory_space<vmem>>, vector<1x1x8x8xf32>
    %46 = vector.shape_cast %45 : vector<1x1x8x8xf32> to vector<1x8x8xf32>
    %47 = vector.shape_cast %44 : vector<1x8x8xf32> to vector<1x1x8x8xf32>
    tpu.vector_store %arg14[%c0_33, %c0_34, %c0_35, %c0_36], %47 {strides = array<i32>} : memref<1x4x8x8xf32, #tpu.memory_space<vmem>>, vector<1x1x8x8xf32>,
    %48 = vector.extract_strided_slice %25 {offsets = [0, 0, 0], sizes = [1, 8, 8], strides = [1, 1, 1]} : vector<1x8x32xf32> to vector<1x8x8xf32>
    "tpu.trace_start"() <{level = 10 : i32, message = "bqk,bkd->bqd"}> : () -> ()
    %cst_37 = arith.constant dense<0.000000e+00> : vector<1x8x8xf32>
    %49 = tpu.matmul %44, %48, %cst_37 {dimension_numbers = #tpu.dot_dimension_numbers<[2], [1], [1], [2], [0, 0, 0, 1, 1, 2], [0], [0]>} : vector<1x8x8xf32>, vector<1x8x8xf32>, vector<1x8x8xf32> -> vector<1x8x8xf32>
    "tpu.trace_stop"() : () -> ()
    %50 = vector.extract_strided_slice %26 {offsets = [0, 0, 8], sizes = [1, 8, 8], strides = [1, 1, 1]} : vector<1x8x32xf32> to vector<1x8x8xf32>
    %51 = vector.extract_strided_slice %24 {offsets = [0, 0, 8], sizes = [1, 8, 8], strides = [1, 1, 1]} : vector<1x8x32xf32> to vector<1x8x8xf32>
    "tpu.trace_start"() <{level = 10 : i32, message = "bqd,bkd->bqk"}> : () -> ()
    %cst_38 = arith.constant dense<0.000000e+00> : vector<1x8x8xf32>
    %52 = tpu.matmul %50, %51, %cst_38 {dimension_numbers = #tpu.dot_dimension_numbers<[2], [2], [1], [1], [0, 0, 0, 1, 1, 1], [0], [0]>} : vector<1x8x8xf32>, vector<1x8x8xf32>, vector<1x8x8xf32> -> vector<1x8x8xf32>
    %cst_39 = arith.constant -3.40282347E+38 : f32
    "tpu.trace_stop"() : () -> ()
    %53 = vector.broadcast %cst_39 : f32 to vector<1x8x8xf32>
    %54 = arith.select %29, %53, %52 : vector<1x8x8xi1>, vector<1x8x8xf32>
    %cst_40 = arith.constant dense<0xFF800000> : vector<1x8xf32>
    %55 = vector.multi_reduction <maximumf>, %54, %cst_40 [2] : vector<1x8x8xf32> to vector<1x8xf32>
    %56 = vector.shape_cast %55 : vector<1x8xf32> to vector<1x8x1xf32>
    %57 = vector.broadcast %56 : vector<1x8x1xf32> to vector<1x8x8xf32>
    %58 = arith.subf %54, %57 : vector<1x8x8xf32>
    %59 = math.exp %58 : vector<1x8x8xf32>
    %cst_41 = arith.constant dense<0.000000e+00> : vector<1x8xf32>
    %60 = vector.multi_reduction <add>, %59, %cst_41 [2] : vector<1x8x8xf32> to vector<1x8xf32>
    %61 = vector.shape_cast %60 : vector<1x8xf32> to vector<1x8x1xf32>
    %62 = tpu.reciprocal %61 : vector<1x8x1xf32> -> vector<1x8x1xf32>
    %63 = vector.broadcast %62 : vector<1x8x1xf32> to vector<1x8x8xf32>
    %64 = arith.mulf %59, %63 : vector<1x8x8xf32>
    %c0_42 = arith.constant 0 : index
    %c1 = arith.constant 1 : index
    %c0_43 = arith.constant 0 : index
    %c0_44 = arith.constant 0 : index
    %65 = vector.load %arg14[%c0_42, %c1, %c0_43, %c0_44] : memref<1x4x8x8xf32, #tpu.memory_space<vmem>>, vector<1x1x8x8xf32>
    %66 = vector.shape_cast %65 : vector<1x1x8x8xf32> to vector<1x8x8xf32>
    %67 = vector.shape_cast %64 : vector<1x8x8xf32> to vector<1x1x8x8xf32>
    tpu.vector_store %arg14[%c0_42, %c1, %c0_43, %c0_44], %67 {strides = array<i32>} : memref<1x4x8x8xf32, #tpu.memory_space<vmem>>, vector<1x1x8x8xf32>,
    %68 = vector.extract_strided_slice %25 {offsets = [0, 0, 8], sizes = [1, 8, 8], strides = [1, 1, 1]} : vector<1x8x32xf32> to vector<1x8x8xf32>
    "tpu.trace_start"() <{level = 10 : i32, message = "bqk,bkd->bqd"}> : () -> ()
    %cst_45 = arith.constant dense<0.000000e+00> : vector<1x8x8xf32>
    %69 = tpu.matmul %64, %68, %cst_45 {dimension_numbers = #tpu.dot_dimension_numbers<[2], [1], [1], [2], [0, 0, 0, 1, 1, 2], [0], [0]>} : vector<1x8x8xf32>, vector<1x8x8xf32>, vector<1x8x8xf32> -> vector<1x8x8xf32>
    "tpu.trace_stop"() : () -> ()
    %70 = vector.extract_strided_slice %26 {offsets = [0, 0, 16], sizes = [1, 8, 8], strides = [1, 1, 1]} : vector<1x8x32xf32> to vector<1x8x8xf32>
    %71 = vector.extract_strided_slice %24 {offsets = [0, 0, 16], sizes = [1, 8, 8], strides = [1, 1, 1]} : vector<1x8x32xf32> to vector<1x8x8xf32>
    "tpu.trace_start"() <{level = 10 : i32, message = "bqd,bkd->bqk"}> : () -> ()
    %cst_46 = arith.constant dense<0.000000e+00> : vector<1x8x8xf32>
    %72 = tpu.matmul %70, %71, %cst_46 {dimension_numbers = #tpu.dot_dimension_numbers<[2], [2], [1], [1], [0, 0, 0, 1, 1, 1], [0], [0]>} : vector<1x8x8xf32>, vector<1x8x8xf32>, vector<1x8x8xf32> -> vector<1x8x8xf32>
    %cst_47 = arith.constant -3.40282347E+38 : f32
    "tpu.trace_stop"() : () -> ()
    %73 = vector.broadcast %cst_47 : f32 to vector<1x8x8xf32>
    %74 = arith.select %29, %73, %72 : vector<1x8x8xi1>, vector<1x8x8xf32>
    %cst_48 = arith.constant dense<0xFF800000> : vector<1x8xf32>
    %75 = vector.multi_reduction <maximumf>, %74, %cst_48 [2] : vector<1x8x8xf32> to vector<1x8xf32>
    %76 = vector.shape_cast %75 : vector<1x8xf32> to vector<1x8x1xf32>
    %77 = vector.broadcast %76 : vector<1x8x1xf32> to vector<1x8x8xf32>
    %78 = arith.subf %74, %77 : vector<1x8x8xf32>
    %79 = math.exp %78 : vector<1x8x8xf32>
    %cst_49 = arith.constant dense<0.000000e+00> : vector<1x8xf32>
    %80 = vector.multi_reduction <add>, %79, %cst_49 [2] : vector<1x8x8xf32> to vector<1x8xf32>
    %81 = vector.shape_cast %80 : vector<1x8xf32> to vector<1x8x1xf32>
    %82 = tpu.reciprocal %81 : vector<1x8x1xf32> -> vector<1x8x1xf32>
    %83 = vector.broadcast %82 : vector<1x8x1xf32> to vector<1x8x8xf32>
    %84 = arith.mulf %79, %83 : vector<1x8x8xf32>
    %c0_50 = arith.constant 0 : index
    %c2 = arith.constant 2 : index
    %c0_51 = arith.constant 0 : index
    %c0_52 = arith.constant 0 : index
    %85 = vector.load %arg14[%c0_50, %c2, %c0_51, %c0_52] : memref<1x4x8x8xf32, #tpu.memory_space<vmem>>, vector<1x1x8x8xf32>
    %86 = vector.shape_cast %85 : vector<1x1x8x8xf32> to vector<1x8x8xf32>
    %87 = vector.shape_cast %84 : vector<1x8x8xf32> to vector<1x1x8x8xf32>
    tpu.vector_store %arg14[%c0_50, %c2, %c0_51, %c0_52], %87 {strides = array<i32>} : memref<1x4x8x8xf32, #tpu.memory_space<vmem>>, vector<1x1x8x8xf32>,
    %88 = vector.extract_strided_slice %25 {offsets = [0, 0, 16], sizes = [1, 8, 8], strides = [1, 1, 1]} : vector<1x8x32xf32> to vector<1x8x8xf32>
    "tpu.trace_start"() <{level = 10 : i32, message = "bqk,bkd->bqd"}> : () -> ()
    %cst_53 = arith.constant dense<0.000000e+00> : vector<1x8x8xf32>
    %89 = tpu.matmul %84, %88, %cst_53 {dimension_numbers = #tpu.dot_dimension_numbers<[2], [1], [1], [2], [0, 0, 0, 1, 1, 2], [0], [0]>} : vector<1x8x8xf32>, vector<1x8x8xf32>, vector<1x8x8xf32> -> vector<1x8x8xf32>
    "tpu.trace_stop"() : () -> ()
    %90 = vector.extract_strided_slice %26 {offsets = [0, 0, 24], sizes = [1, 8, 8], strides = [1, 1, 1]} : vector<1x8x32xf32> to vector<1x8x8xf32>
    %91 = vector.extract_strided_slice %24 {offsets = [0, 0, 24], sizes = [1, 8, 8], strides = [1, 1, 1]} : vector<1x8x32xf32> to vector<1x8x8xf32>
    "tpu.trace_start"() <{level = 10 : i32, message = "bqd,bkd->bqk"}> : () -> ()
    %cst_54 = arith.constant dense<0.000000e+00> : vector<1x8x8xf32>
    %92 = tpu.matmul %90, %91, %cst_54 {dimension_numbers = #tpu.dot_dimension_numbers<[2], [2], [1], [1], [0, 0, 0, 1, 1, 1], [0], [0]>} : vector<1x8x8xf32>, vector<1x8x8xf32>, vector<1x8x8xf32> -> vector<1x8x8xf32>
    %cst_55 = arith.constant -3.40282347E+38 : f32
    "tpu.trace_stop"() : () -> ()
    %93 = vector.broadcast %cst_55 : f32 to vector<1x8x8xf32>
    %94 = arith.select %29, %93, %92 : vector<1x8x8xi1>, vector<1x8x8xf32>
    %cst_56 = arith.constant dense<0xFF800000> : vector<1x8xf32>
    %95 = vector.multi_reduction <maximumf>, %94, %cst_56 [2] : vector<1x8x8xf32> to vector<1x8xf32>
    %96 = vector.shape_cast %95 : vector<1x8xf32> to vector<1x8x1xf32>
    %97 = vector.broadcast %96 : vector<1x8x1xf32> to vector<1x8x8xf32>
    %98 = arith.subf %94, %97 : vector<1x8x8xf32>
    %99 = math.exp %98 : vector<1x8x8xf32>
    %cst_57 = arith.constant dense<0.000000e+00> : vector<1x8xf32>
    %100 = vector.multi_reduction <add>, %99, %cst_57 [2] : vector<1x8x8xf32> to vector<1x8xf32>
    %101 = vector.shape_cast %100 : vector<1x8xf32> to vector<1x8x1xf32>
    %102 = tpu.reciprocal %101 : vector<1x8x1xf32> -> vector<1x8x1xf32>
    %103 = vector.broadcast %102 : vector<1x8x1xf32> to vector<1x8x8xf32>
    %104 = arith.mulf %99, %103 : vector<1x8x8xf32>
    %c0_58 = arith.constant 0 : index
    %c3 = arith.constant 3 : index
    %c0_59 = arith.constant 0 : index
    %c0_60 = arith.constant 0 : index
    %105 = vector.load %arg14[%c0_58, %c3, %c0_59, %c0_60] : memref<1x4x8x8xf32, #tpu.memory_space<vmem>>, vector<1x1x8x8xf32>
    %106 = vector.shape_cast %105 : vector<1x1x8x8xf32> to vector<1x8x8xf32>
    %107 = vector.shape_cast %104 : vector<1x8x8xf32> to vector<1x1x8x8xf32>
    tpu.vector_store %arg14[%c0_58, %c3, %c0_59, %c0_60], %107 {strides = array<i32>} : memref<1x4x8x8xf32, #tpu.memory_space<vmem>>, vector<1x1x8x8xf32>,
    %108 = vector.extract_strided_slice %25 {offsets = [0, 0, 24], sizes = [1, 8, 8], strides = [1, 1, 1]} : vector<1x8x32xf32> to vector<1x8x8xf32>
    "tpu.trace_start"() <{level = 10 : i32, message = "bqk,bkd->bqd"}> : () -> ()
    %cst_61 = arith.constant dense<0.000000e+00> : vector<1x8x8xf32>
    %109 = tpu.matmul %104, %108, %cst_61 {dimension_numbers = #tpu.dot_dimension_numbers<[2], [1], [1], [2], [0, 0, 0, 1, 1, 2], [0], [0]>} : vector<1x8x8xf32>, vector<1x8x8xf32>, vector<1x8x8xf32> -> vector<1x8x8xf32>
    "tpu.trace_stop"() : () -> ()
    %110 = tpu.concatenate %49, %69, %89, %109 in 2 : vector<1x8x8xf32>, vector<1x8x8xf32>, vector<1x8x8xf32>, vector<1x8x8xf32> -> vector<1x8x32xf32>
    %111 = vector.shape_cast %110 : vector<1x8x32xf32> to vector<8x32xf32>
    %cst_62 = arith.constant dense<0.000000e+00> : vector<8x32xf32>
    %112 = tpu.matmul %111, %3, %cst_62 {dimension_numbers = #tpu.dot_dimension_numbers<[1], [0], [0], [1], [0, 0, 1, 1], [], []>} : vector<8x32xf32>, vector<32x32xf32>, vector<8x32xf32> -> vector<8x32xf32>
    %c0_63 = arith.constant 0 : index
    %c0_64 = arith.constant 0 : index
    %113 = vector.load %arg12[%c0_63, %c0_64] : memref<1x32xf32, #tpu.memory_space<vmem>>, vector<1x32xf32>
    %114 = vector.broadcast %113 : vector<1x32xf32> to vector<8x32xf32>
    %115 = arith.addf %112, %114 : vector<8x32xf32>
    %116 = vector.shape_cast %115 : vector<8x32xf32> to vector<1x8x32xf32>
    %c0_65 = arith.constant 0 : index
    %c0_66 = arith.constant 0 : index
    %c0_67 = arith.constant 0 : index
    %117 = vector.load %arg13[%c0_65, %c0_66, %c0_67] : memref<1x8x32xf32, #tpu.memory_space<vmem>>, vector<1x8x32xf32>
    tpu.vector_store %arg13[%c0_65, %c0_66, %c0_67], %116 {strides = array<i32>} : memref<1x8x32xf32, #tpu.memory_space<vmem>>, vector<1x8x32xf32>,
    return
  }
  func.func @transform_0(%arg0: i32) -> (i32, i32, i32) {
    %c0_i32 = arith.constant 0 : i32
    %c0_i32_0 = arith.constant 0 : i32
    %c0_i32_1 = arith.constant 0 : i32
    return %arg0, %c0_i32, %c0_i32_0 : i32, i32, i32
  }
  func.func @transform_1(%arg0: i32) -> (i32, i32, i32) {
    %c0_i32 = arith.constant 0 : i32
    %c0_i32_0 = arith.constant 0 : i32
    %c0_i32_1 = arith.constant 0 : i32
    return %arg0, %c0_i32, %c0_i32_0 : i32, i32, i32
  }
  func.func @transform_2(%arg0: i32) -> (i32, i32, i32) {
    %c0_i32 = arith.constant 0 : i32
    %c0_i32_0 = arith.constant 0 : i32
    %c0_i32_1 = arith.constant 0 : i32
    return %arg0, %c0_i32, %c0_i32_0 : i32, i32, i32
  }
  func.func @transform_3(%arg0: i32) -> (i32, i32, i32) {
    %c0_i32 = arith.constant 0 : i32
    %c0_i32_0 = arith.constant 0 : i32
    %c0_i32_1 = arith.constant 0 : i32
    return %arg0, %c0_i32, %c0_i32_0 : i32, i32, i32
  }
  func.func @transform_4(%arg0: i32) -> (i32, i32) {
    %c0_i32 = arith.constant 0 : i32
    %c0_i32_0 = arith.constant 0 : i32
    %c0_i32_1 = arith.constant 0 : i32
    return %c0_i32, %c0_i32_0 : i32, i32
  }
  func.func @transform_5(%arg0: i32) -> (i32, i32) {
    %c0_i32 = arith.constant 0 : i32
    %c0_i32_0 = arith.constant 0 : i32
    %c0_i32_1 = arith.constant 0 : i32
    return %c0_i32, %c0_i32_0 : i32, i32
  }
  func.func @transform_6(%arg0: i32) -> (i32, i32) {
    %c0_i32 = arith.constant 0 : i32
    %c0_i32_0 = arith.constant 0 : i32
    %c0_i32_1 = arith.constant 0 : i32
    return %c0_i32, %c0_i32_0 : i32, i32
  }
  func.func @transform_7(%arg0: i32) -> (i32, i32) {
    %c0_i32 = arith.constant 0 : i32
    %c0_i32_0 = arith.constant 0 : i32
    %c0_i32_1 = arith.constant 0 : i32
    return %c0_i32, %c0_i32_0 : i32, i32
  }
  func.func @transform_8(%arg0: i32) -> (i32, i32) {
    %c0_i32 = arith.constant 0 : i32
    %c0_i32_0 = arith.constant 0 : i32
    %c0_i32_1 = arith.constant 0 : i32
    return %c0_i32, %c0_i32_0 : i32, i32
  }
  func.func @transform_9(%arg0: i32) -> (i32, i32) {
    %c0_i32 = arith.constant 0 : i32
    %c0_i32_0 = arith.constant 0 : i32
    %c0_i32_1 = arith.constant 0 : i32
    return %c0_i32, %c0_i32_0 : i32, i32
  }
  func.func @transform_10(%arg0: i32) -> (i32, i32) {
    %c0_i32 = arith.constant 0 : i32
    %c0_i32_0 = arith.constant 0 : i32
    %c0_i32_1 = arith.constant 0 : i32
    return %c0_i32, %c0_i32_0 : i32, i32
  }
  func.func @transform_11(%arg0: i32) -> (i32, i32) {
    %c0_i32 = arith.constant 0 : i32
    %c0_i32_0 = arith.constant 0 : i32
    %c0_i32_1 = arith.constant 0 : i32
    return %c0_i32, %c0_i32_0 : i32, i32
  }
  func.func @transform_12(%arg0: i32) -> (i32, i32, i32) {
    %c0_i32 = arith.constant 0 : i32
    %c0_i32_0 = arith.constant 0 : i32
    %c0_i32_1 = arith.constant 0 : i32
    return %arg0, %c0_i32, %c0_i32_0 : i32, i32, i32
  }
  func.func @transform_13(%arg0: i32) -> (i32, i32, i32, i32) {
    %c0_i32 = arith.constant 0 : i32
    %c0_i32_0 = arith.constant 0 : i32
    %c0_i32_1 = arith.constant 0 : i32
    %c0_i32_2 = arith.constant 0 : i32
    return %arg0, %c0_i32, %c0_i32_0, %c0_i32_1 : i32, i32, i32, i32
  }
}

</mosaic_0001>

<bundles_post_ra>
// kernel: tpu_custom_call.1
= control target key start
LH: loop header
LB: loop body
LE: loop exit
PB: predicated region body
PF: predicated region fallthrough
CT: control target
= control target key end

     0   :  { %s3148_s0 = inlined_call_operand.hbm [shape: f32[2,8,32], index: 0, kind: input, shape index: {}]   ;;  %s3149_s1 = inlined_call_operand.hbm [shape: f32[2,8,32], index: 1, kind: input, shape index: {}]   ;;  %s3150_s2 = inlined_call_operand.hbm [shape: f32[2,8,32], index: 2, kind: input, shape index: {}]   ;;  %s3151_s3 = inlined_call_operand.hbm [shape: f32[2,8,8], index: 3, kind: input, shape index: {}]   ;;  %s3152_s4 = inlined_call_operand.hbm [shape: f32[32,32], index: 4, kind: input, shape index: {}]   ;;  %s3153_s5 = inlined_call_operand.vmem [shape: f32[1,32], index: 5, kind: input, shape index: {}]   ;;  %s3154_s6 = inlined_call_operand.hbm [shape: f32[32,32], index: 6, kind: input, shape index: {}]   ;;  %s3155_s7 = inlined_call_operand.vmem [shape: f32[1,32], index: 7, kind: input, shape index: {}]   ;;  %s3156_s8 = inlined_call_operand.hbm [shape: f32[32,32], index: 8, kind: input, shape index: {}]   ;;  %s3157_s9 = inlined_call_operand.vmem [shape: f32[1,32], index: 9, kind: input, shape index: {}]   ;;  %s3158_s10 = inlined_call_operand.vmem [shape: f32[32,32], index: 10, kind: input, shape index: {}]   ;;  %s3159_s11 = inlined_call_operand.vmem [shape: f32[1,32], index: 11, kind: input, shape index: {}]   ;;  %s3160_s12 = inlined_call_operand.hbm [shape: f32[2,8,32], index: 12, kind: output, shape index: {0}]   ;;  %s3161_s13 = inlined_call_operand.hbm [shape: f32[2,4,8,8], index: 13, kind: output, shape index: {1}]  }
   0x1   :  { %3184 = sst [smem:[#allocation29_spill]] %s3149_s1 }
   0x2   :  { %3185 = sst [smem:[#allocation30_spill]] %s3152_s4 }
   0x3   :  { %3186 = sst [smem:[#allocation31_spill]] %s3154_s6 }
   0x4   :  { %3187 = sst [smem:[#allocation32_spill]] %s3158_s10 }
   0x5   :  { %3188 = sst [smem:[#allocation33_spill]] %s3159_s11 }
   0x6   :  { %3189 = sst [smem:[#allocation34_spill]] %s3160_s12 }
   0x7   :  { %3190 = sst [smem:[#allocation35_spill]] %s3161_s13 }
   0x8   :  { %19 = vsyncpa [#allocation3], 0 }
   0x9   :  { %21 = vsyncpa [#allocation3 + $0x1], 0 }
   0xa   :  { %22 = vsyncpa [#allocation6], 0 }
   0xb   :  { %24 = vsyncpa [#allocation6 + $0x1], 0 }
   0xc   :  { %25 = vsyncpa [#allocation9], 0 }
   0xd   :  { %27 = vsyncpa [#allocation9 + $0x1], 0 }
   0xe   :  { %28 = vsyncpa [#allocation12], 0 }
   0xf   :  { %29 = vsyncpa [#allocation4], 0 }
  0x10   :  { %31 = vsyncpa [#allocation4 + $0x1], 0 }
  0x11   :  { %32 = vsyncpa [#allocation16], 0 }
  0x12   :  { %34 = vsyncpa [#allocation16 + $0x1], 0  ;;  %s2613_s25 = smov 0   ;;  %s2615_s26 = smov 0  }
  0x13   :  { %s2617_s27 = smov 0   ;;  %s2619_s28 = smov 0  }
  0x14 LB: > { %3191 = sst [smem:[#allocation24_spill]] %s2508_s25  ;;  %s2634_s29 = sadd.s32 4294967295, %s2520_s28   ;;  %s2520_s28 = sphi %s2619_s28, %s3233_s28   ;;  %s2516_s27 = sphi %s2617_s27, %s3237_s27   ;;  %s2512_s26 = sphi %s2615_s26, %s3236_s26   ;;  %s2508_s25 = sphi %s2613_s25, %s3235_s25  }
  0x15   : > { %s1878_s30 = sadd.s32 4294967294, %s2520_s28   ;;  %p60_p0 = scmp.ne.s32.totalorder %s2512_s26, %s2508_s25 }
  0x16   : > { %p3164_p1 = scmp.eq.s32.totalorder %s2634_s29, 0  ;;  %p336_p3 = scmp.eq.s32.totalorder %s1878_s30, 1 }
  0x17   : > { %p1879_p5 = scmp.ge.s32.totalorder %s2520_s28, 1  ;;  %p369_p7 = scmp.lt.s32.totalorder %s2520_s28, 3 }
  0x18   : > { %p2643_p4 = por %p3164_p1, %p60_p0  ;;  %p2648_p6 = por %p336_p3, %p60_p0 }
  0x19   : > { %p2653_p8 = pnand %p1879_p5, %p369_p7  ;;  %s2522_s17 = smov [#allocation10]  }
  0x1a   : > { %s3192_s14 = scalar_select %p2643_p4, 1, 0 }
  0x1b   : > { %s3193_s15 = scalar_select %p2648_p6, 1, 0 }
  0x1c   : > { %s3195_s16 = scalar_select %p2653_p8, 1, 0 }
  0x1d   : > { %3194 = sst [smem:[#allocation25_spill]] %s3193_s15  ;;  %s381_s18 = sshll.u32 %s2522_s17, 4  ;;  %s2657_s18 = int_to_ptr.vmem [resolvable:$true] %s381_s18 }
  0x1e   : > { %p2101_p9 = pneg %p2653_p8  ;;  %s2523_s20 = smov [#allocation11]  }
  0x1f   : > { %s397_s21 = sshll.u32 %s2523_s20, 4  ;;  %s3197_s4 = sld [smem:[#allocation30_spill]]  ;;  %s2668_s21 = int_to_ptr.vmem [resolvable:$true] %s397_s21 }
  0x20   : > { %p2664_p11 = pnand %p2101_p9, %p3164_p1 }
  0x22   : > { %s3196_s19 = scalar_select %p2664_p11, 1, 0 }
  0x23   : > { %p2678_p13 = pneg %p2664_p11 }
  0x25   : > { %s2202_s24 = scalar_lea.hbm %s3197_s4, 512 }
  0x26   : > { %p2203_p12 = scmp.ne.s32.totalorder %s3197_s4, %s2202_s24  ;;  %p2209_p5 = scmp.lt.u32.totalorder %s2202_s24, %s3197_s4 }
  0x27   : > { %s3198_s15 = scalar_select %p2678_p13, 1, 0 }
  0x28   : > { %p2205_p0 = pnand %p2678_p13, %p2203_p12 }
  0x2a   : > { %p2206_p3 = pneg %p2205_p0 }
  0x2c   : > { %p2211_p7 = pnand %p2209_p5, %p2206_p3 }
  0x2e   : > { %2214 = shalt.err (!%p2211_p7)
}
  0x2f   : > { %s2215_s22 = scalar_lea.vmem %s2657_s18, 512  ;;  %p2223_p2 = scmp.lt.s32.totalorder %s2657_s18, %s2657_s18 }
  0x30   : > { %p2216_p9 = scmp.ne.s32.totalorder %s2657_s18, %s2215_s22  ;;  %p2224_p6 = scmp.lt.s32.totalorder %s2215_s22, %s2215_s22 }
  0x32   : > { %p2218_p10 = pnand %p2216_p9, %p2678_p13  ;;  %p2225_p12 = por %p2224_p6, %p2223_p2 }
  0x34   : > { %p2219_p1 = pneg %p2218_p10 }
  0x36   : > { %p2226_p0 = pnand %p2225_p12, %p2219_p1 }
  0x38   : > { %2229 = shalt.err (!%p2226_p0)
}
  0x39   : > { %s3169_s23 = smov 128   ;;  %s3170_s25 = smov 8  }
  0x3a   : > { %2104 = dma.hbm_to_vmem [thread:$0]  (!%p2664_p11), %s3197_s4, 512, %s2657_s18, [#allocation9], %s3169_s23, %s3169_s23, %s3170_s25  }
  0x3b   : > { %s3199_s6 = sld [smem:[#allocation31_spill]] }
  0x41   : > { %s2230_s22 = scalar_lea.hbm %s3199_s6, 512 }
  0x42   : > { %p2231_p1 = scmp.ne.s32.totalorder %s3199_s6, %s2230_s22  ;;  %p2237_p10 = scmp.lt.u32.totalorder %s2230_s22, %s3199_s6 }
  0x44   : > { %p2233_p2 = pnand %p2231_p1, %p2678_p13 }
  0x46   : > { %p2234_p6 = pneg %p2233_p2 }
  0x48   : > { %p2239_p3 = pnand %p2237_p10, %p2234_p6 }
  0x4a   : > { %2242 = shalt.err (!%p2239_p3)
}
  0x4b   : > { %s2243_s18 = scalar_lea.vmem %s2668_s21, 512  ;;  %p2251_p12 = scmp.lt.s32.totalorder %s2668_s21, %s2668_s21 }
  0x4c   : > { %p2244_p5 = scmp.ne.s32.totalorder %s2668_s21, %s2243_s18  ;;  %p2252_p0 = scmp.lt.s32.totalorder %s2243_s18, %s2243_s18 }
  0x4e   : > { %p2246_p7 = pnand %p2244_p5, %p2678_p13  ;;  %p2253_p1 = por %p2252_p0, %p2251_p12 }
  0x50   : > { %p2247_p9 = pneg %p2246_p7 }
  0x52   : > { %p2254_p2 = pnand %p2253_p1, %p2247_p9 }
  0x54   : > { %2257 = shalt.err (!%p2254_p2)
}
  0x55   : > { %2107 = dma.hbm_to_vmem [thread:$0]  (!%p2664_p11), %s3199_s6, 512, %s2668_s21, [#allocation12], %s3169_s23, %s3169_s23, %s3170_s25  }
  0x56   : > { %s2729_s12 = sadd.s32 1, %s2520_s28   ;;  %s47_s13 = sadd.s32 1, %s2516_s27 }
  0x57   : > { %3200 = sst [smem:[#allocation26_spill]] %s2729_s12  ;;  %s44_s24 = ssub.s32 %s2520_s28, %s2729_s12 }
  0x58   : > { %p54_p6 = scmp.ne.s32.totalorder %s2516_s27, %s2512_s26  ;;  %p45_p10 = scmp.eq.s32.totalorder %s44_s24, 0 }
  0x59   : > { %p55_p3 = scmp.eq.s32.totalorder %s2520_s28, 0  ;;  %p3201_p5 = scmp.eq.s32.totalorder %s2634_s29, 1 }
  0x5a   : > { %p2134_p9 = scmp.lt.s32.totalorder %s2520_s28, 2  ;;  %s3168_s20 = sand.u32 1, %s2516_s27  }
  0x5b   : > { %p2739_p7 = por %p3201_p5, %p54_p6  ;;  %p56_p12 = por %p55_p3, %p54_p6 }
  0x5c   : > { %s2745_s17 = scalar_select %p45_p10, %s2516_s27, %s47_s13  }
  0x5d   : > { %s3202_s30 = scalar_select %p2739_p7, 1, 0 }
  0x5e   : > { %3204 = sst [smem:[#allocation28_spill]] %s2745_s17  ;;  %s2750_s21 = sshll.u32 %s3168_s20, 3 }
  0x5f   : > { %3203 = sst [smem:[#allocation27_spill]] %s3202_s30  ;;  %s2753_s22 = sshll.u32 %s2520_s28, 7 }
  0x60   : > { %p2755_p0 = pnand %p2134_p9, %p56_p12  ;;  %s3175_s10 = sand.u32 1, %s2520_s28  }
  0x61   : > { %s3206_s1 = sld [smem:[#allocation29_spill]]  ;;  %s458_s20 = scalar_lea.vmem [#allocation5], %s2750_s21 }
  0x62   : > { %s3205_s18 = scalar_select %p2755_p0, 1, 0 }
  0x63   : > { %s465_s23 = sshll.u32 %s458_s20, 4  ;;  %s2771_s25 = scalar_lea.sflag [#allocation6], %s3175_s10  ;;  %s2767_s23 = int_to_ptr.vmem [resolvable:$true] %s465_s23 }
  0x64   : > { %p2777_p2 = pneg %p2755_p0 }
  0x67   : > { %s2764_s13 = scalar_lea.hbm %s3206_s1, %s2753_s22  ;;  %s2263_s20 = scalar_lea.hbm %s3206_s1, 256 }
  0x68   : > { %s2258_s4 = scalar_lea.hbm %s2764_s13, 128  ;;  %p2264_p3 = scmp.lt.u32.totalorder %s2764_s13, %s3206_s1 }
  0x69   : > { %p2259_p1 = scmp.ne.s32.totalorder %s2764_s13, %s2258_s4  ;;  %p2265_p5 = scmp.lt.u32.totalorder %s2263_s20, %s2258_s4 }
  0x6a   : > { %p2267_p12 = scmp.lt.u32.totalorder %s2258_s4, %s2764_s13 }
  0x6b   : > { %p2261_p6 = pnand %p2777_p2, %p2259_p1  ;;  %p2266_p9 = por %p2265_p5, %p2264_p3 }
  0x6d   : > { %p2262_p10 = pneg %p2261_p6  ;;  %p2268_p7 = por %p2267_p12, %p2266_p9 }
  0x6f   : > { %p2269_p4 = pnand %p2268_p7, %p2262_p10 }
  0x71   : > { %2272 = shalt.err (!%p2269_p4)
}
  0x72   : > { %s2273_s10 = scalar_lea.vmem %s2767_s23, 128  ;;  %s2526_s11 = smov [#allocation5]  }
  0x73   : > { %p2274_p1 = scmp.ne.s32.totalorder %s2767_s23, %s2273_s10  ;;  %s2278_s24 = sshll.u32 %s2526_s11, 4  ;;  %s2279_s24 = int_to_ptr.vmem [resolvable:$false] %s2278_s24 }
  0x74   : > { %s2280_s12 = scalar_lea.vmem %s2279_s24, 256  ;;  %p2281_p11 = scmp.lt.s32.totalorder %s2767_s23, %s2279_s24 }
  0x75   : > { %p2276_p6 = pnand %p2274_p1, %p2777_p2  ;;  %p2282_p13 = scmp.lt.s32.totalorder %s2280_s12, %s2273_s10 }
  0x77   : > { %p2277_p8 = pneg %p2276_p6  ;;  %p2283_p3 = por %p2282_p13, %p2281_p11 }
  0x79   : > { %p2284_p5 = pnand %p2283_p3, %p2277_p8 }
  0x7b   : > { %2287 = shalt.err (!%p2284_p5)
}
  0x7c   : > { %2117 = dma.hbm_to_vmem [thread:$0]  (!%p2755_p0), %s2764_s13, 128, %s2767_s23, %s2771_s25  }
  0x7d   : > { %s2527_s4 = smov [#allocation13]   ;;  %s2288_s11 = scalar_lea.hbm %s3156_s8, 512 }
  0x7e   : > { %s413_s17 = sshll.u32 %s2527_s4, 4  ;;  %p2289_p4 = scmp.ne.s32.totalorder %s3156_s8, %s2288_s11  ;;  %s414_s17 = int_to_ptr.vmem [resolvable:$true] %s413_s17 }
  0x7f   : > { %p3208_p8 = scmp.ne.s32.totalorder %s3198_s15, 0  ;;  %p2295_p7 = scmp.lt.u32.totalorder %s2288_s11, %s3156_s8 }
  0x81   : > { %p2291_p11 = pnand %p2289_p4, %p3208_p8 }
  0x83   : > { %p2292_p13 = pneg %p2291_p11 }
  0x85   : > { %p2297_p10 = pnand %p2295_p7, %p2292_p13 }
  0x87   : > { %2300 = shalt.err (!%p2297_p10)
}
  0x88   : > { %s2301_s23 = scalar_lea.vmem %s414_s17, 512  ;;  %p2309_p6 = scmp.lt.s32.totalorder %s414_s17, %s414_s17 }
  0x89   : > { %p2302_p9 = scmp.ne.s32.totalorder %s414_s17, %s2301_s23  ;;  %p2310_p3 = scmp.lt.s32.totalorder %s2301_s23, %s2301_s23 }
  0x8b   : > { %p2304_p12 = pnand %p2302_p9, %p3208_p8  ;;  %p2311_p5 = por %p2310_p3, %p2309_p6 }
  0x8d   : > { %p2305_p1 = pneg %p2304_p12 }
  0x8f   : > { %p2312_p0 = pnand %p2311_p5, %p2305_p1 }
  0x91   : > { %2315 = shalt.err (!%p2312_p0)
}
  0x92   : > { %p3209_p4 = scmp.ne.s32.totalorder %s3196_s19, 0  ;;  %s3210_s1 = smov 8  }
  0x93   : > { %s3211_s30 = smov 128   ;;  %s2826_s11 = scalar_lea.hbm %s3148_s0, %s2753_s22 }
  0x94   : > { %2110 = dma.hbm_to_vmem [thread:$0]  (!%p3209_p4), %s3156_s8, 512, %s414_s17, [#allocation12], %s3211_s30, %s3211_s30, %s3210_s1  }
  0x95   : > { %s440_s19 = scalar_lea.vmem [#allocation2], %s2750_s21  ;;  %s3212_s10 = sand.u32 1, %s2516_s27  }
  0x96   : > { %s447_s24 = sshll.u32 %s440_s19, 4  ;;  %s437_s12 = scalar_lea.sflag [#allocation3], %s3212_s10  ;;  %s448_s24 = int_to_ptr.vmem [resolvable:$true] %s447_s24 }
  0x97   : > { %s2316_s23 = scalar_lea.hbm %s2826_s11, 128  ;;  %s2321_s30 = scalar_lea.hbm %s3148_s0, 256 }
  0x98   : > { %p2317_p0 = scmp.ne.s32.totalorder %s2826_s11, %s2316_s23  ;;  %p2322_p13 = scmp.lt.u32.totalorder %s2826_s11, %s3148_s0 }
  0x99   : > { %p2323_p7 = scmp.lt.u32.totalorder %s2321_s30, %s2316_s23  ;;  %p2325_p9 = scmp.lt.u32.totalorder %s2316_s23, %s2826_s11 }
  0x9a   : > { %p2319_p8 = pnand %p2317_p0, %p2777_p2 }
  0x9b   : > { %p2324_p10 = por %p2323_p7, %p2322_p13 }
  0x9c   : > { %p2320_p11 = pneg %p2319_p8 }
  0x9d   : > { %p2326_p12 = por %p2325_p9, %p2324_p10 }
  0x9f   : > { %p2327_p1 = pnand %p2326_p12, %p2320_p11 }
  0xa1   : > { %2330 = shalt.err (!%p2327_p1)
}
  0xa2   : > { %s2331_s15 = scalar_lea.vmem %s448_s24, 128  ;;  %s2528_s20 = smov [#allocation2]  }
  0xa3   : > { %p2332_p6 = scmp.ne.s32.totalorder %s448_s24, %s2331_s15  ;;  %s2336_s19 = sshll.u32 %s2528_s20, 4  ;;  %s2337_s19 = int_to_ptr.vmem [resolvable:$false] %s2336_s19 }
  0xa4   : > { %s2338_s10 = scalar_lea.vmem %s2337_s19, 256  ;;  %p2339_p4 = scmp.lt.s32.totalorder %s448_s24, %s2337_s19 }
  0xa5   : > { %p2334_p3 = pnand %p2332_p6, %p2777_p2  ;;  %p2340_p0 = scmp.lt.s32.totalorder %s2338_s10, %s2331_s15 }
  0xa7   : > { %p2335_p5 = pneg %p2334_p3  ;;  %p2341_p8 = por %p2340_p0, %p2339_p4 }
  0xa9   : > { %p2342_p7 = pnand %p2341_p8, %p2335_p5 }
  0xab   : > { %2345 = shalt.err (!%p2342_p7)
}
  0xac   : > { %p3213_p13 = scmp.ne.s32.totalorder %s3205_s18, 0  ;;  %s2852_s1 = scalar_lea.hbm %s3150_s2, %s2753_s22 }
  0xad   : > { %s476_s30 = scalar_lea.vmem [#allocation7], %s2750_s21  ;;  %s2346_s4 = scalar_lea.hbm %s2852_s1, 128 }
  0xae   : > { %2114 = dma.hbm_to_vmem [thread:$0]  (!%p3213_p13), %s2826_s11, 128, %s448_s24, %s437_s12  }
  0xaf   : > { %s483_s13 = sshll.u32 %s476_s30, 4  ;;  %p2347_p11 = scmp.ne.s32.totalorder %s2852_s1, %s2346_s4  ;;  %s484_s13 = int_to_ptr.vmem [resolvable:$true] %s483_s13 }
  0xb0   : > { %s2351_s11 = scalar_lea.hbm %s3150_s2, 256  ;;  %p2352_p12 = scmp.lt.u32.totalorder %s2852_s1, %s3150_s2 }
  0xb1   : > { %p2349_p10 = pnand %p2347_p11, %p2777_p2  ;;  %p2353_p1 = scmp.lt.u32.totalorder %s2351_s11, %s2346_s4 }
  0xb2   : > { %p2355_p3 = scmp.lt.u32.totalorder %s2346_s4, %s2852_s1 }
  0xb3   : > { %p2350_p9 = pneg %p2349_p10  ;;  %p2354_p6 = por %p2353_p1, %p2352_p12 }
  0xb5   : > { %p2356_p5 = por %p2355_p3, %p2354_p6 }
  0xb7   : > { %p2357_p4 = pnand %p2356_p5, %p2350_p9 }
  0xb9   : > { %2360 = shalt.err (!%p2357_p4)
}
  0xba   : > { %s2361_s19 = scalar_lea.vmem %s484_s13, 128  ;;  %s2529_s10 = smov [#allocation7]  }
  0xbb   : > { %p2362_p0 = scmp.ne.s32.totalorder %s484_s13, %s2361_s19  ;;  %s2366_s23 = sshll.u32 %s2529_s10, 4  ;;  %s2367_s23 = int_to_ptr.vmem [resolvable:$false] %s2366_s23 }
  0xbc   : > { %s2368_s17 = scalar_lea.vmem %s2367_s23, 256  ;;  %p2369_p11 = scmp.lt.s32.totalorder %s484_s13, %s2367_s23 }
  0xbd   : > { %p2364_p8 = pnand %p2362_p0, %p2777_p2  ;;  %p2370_p10 = scmp.lt.s32.totalorder %s2368_s17, %s2361_s19 }
  0xbf   : > { %p2365_p7 = pneg %p2364_p8  ;;  %p2371_p13 = por %p2370_p10, %p2369_p11 }
  0xc1   : > { %p2372_p1 = pnand %p2371_p13, %p2365_p7 }
  0xc3   : > { %2375 = shalt.err (!%p2372_p1)
}
  0xc4   : > { %p3214_p12 = scmp.ne.s32.totalorder %s3205_s18, 0  ;;  %s2877_s15 = scalar_lea.hbm %s3151_s3, %s2753_s22 }
  0xc5   : > { %s494_s20 = scalar_lea.vmem [#allocation8], %s2750_s21  ;;  %s3215_s24 = sand.u32 1, %s2520_s28  }
  0xc6   : > { %2120 = dma.hbm_to_vmem [thread:$0]  (!%p3214_p12), %s2852_s1, 128, %s484_s13, %s2771_s25  }
  0xc7   : > { %s501_s11 = sshll.u32 %s494_s20, 4  ;;  %s491_s12 = scalar_lea.sflag [#allocation9], %s3215_s24  ;;  %s502_s11 = int_to_ptr.vmem [resolvable:$true] %s501_s11 }
  0xc8   : > { %s2376_s19 = scalar_lea.hbm %s2877_s15, 128  ;;  %s2381_s13 = scalar_lea.hbm %s3151_s3, 256 }
  0xc9   : > { %p2377_p13 = scmp.ne.s32.totalorder %s2877_s15, %s2376_s19  ;;  %p2382_p3 = scmp.lt.u32.totalorder %s2877_s15, %s3151_s3 }
  0xca   : > { %p2383_p5 = scmp.lt.u32.totalorder %s2381_s13, %s2376_s19  ;;  %p2385_p0 = scmp.lt.u32.totalorder %s2376_s19, %s2877_s15 }
  0xcb   : > { %p2379_p9 = pnand %p2377_p13, %p2777_p2 }
  0xcc   : > { %p2384_p4 = por %p2383_p5, %p2382_p3 }
  0xcd   : > { %p2380_p6 = pneg %p2379_p9 }
  0xce   : > { %p2386_p8 = por %p2385_p0, %p2384_p4 }
  0xd0   : > { %p2387_p7 = pnand %p2386_p8, %p2380_p6 }
  0xd2   : > { %2390 = shalt.err (!%p2387_p7)
}
  0xd3   : > { %s2391_s21 = scalar_lea.vmem %s502_s11, 128  ;;  %s2530_s23 = smov [#allocation8]  }
  0xd4   : > { %p2392_p11 = scmp.ne.s32.totalorder %s502_s11, %s2391_s21  ;;  %s2396_s17 = sshll.u32 %s2530_s23, 4  ;;  %s2397_s17 = int_to_ptr.vmem [resolvable:$false] %s2396_s17 }
  0xd5   : > { %s2398_s30 = scalar_lea.vmem %s2397_s17, 256  ;;  %p2399_p13 = scmp.lt.s32.totalorder %s502_s11, %s2397_s17 }
  0xd6   : > { %p2394_p10 = pnand %p2392_p11, %p2777_p2  ;;  %p2400_p9 = scmp.lt.s32.totalorder %s2398_s30, %s2391_s21 }
  0xd8   : > { %p2395_p1 = pneg %p2394_p10  ;;  %p2401_p12 = por %p2400_p9, %p2399_p13 }
  0xda   : > { %p2402_p3 = pnand %p2401_p12, %p2395_p1 }
  0xdc   : > { %2405 = shalt.err (!%p2402_p3)
}
  0xdd   : > { %p3216_p5 = scmp.ne.s32.totalorder %s3205_s18, 0  ;;  %p3217_p6 = scmp.ne.s32.totalorder %s3195_s16, 0 }
  0xde   : > { %s2902_s6 = sand.u32 (!%p3217_p6), 1, %s2512_s26   ;;  %p3218_p2 = scmp.ne.s32.totalorder (!%p3217_p6), %s3192_s14, 0 }
  0xdf   : > { %2123 = dma.hbm_to_vmem [thread:$0]  (!%p3216_p5), %s2877_s15, 128, %s502_s11, %s491_s12  }
  0xe0   : > { %510 = sbr.rel (%p3217_p6) target bundleno = 2158 (0x86e), region = 68  ;;  %s2905_s4 = sshll.u32 (!%p3217_p6), %s2902_s6, 3 }
  0xe1   : > { %s513_s20 = scalar_lea.sflag (!%p3217_p6), [#allocation3], %s2902_s6  ;;  %s516_s24 = scalar_lea.vmem (!%p3217_p6), [#allocation2], %s2905_s4 }
  0xe7   : > { %2479 = dma.done.wait (%p3218_p2), %s513_s20, 128  }
  0xe8   : > { %2481 = vsyncadd (%p3218_p2), %s513_s20, 4294967168  ;;  %s521_s16 = sand.u32 1, %s2634_s29   ;;  %s525_s15 = scalar_lea.vmem [#allocation5], %s2905_s4 }
  0xe9   : > { %s522_s18 = scalar_lea.sflag [#allocation6], %s521_s16 }
  0xea   : > { %2483 = dma.done.wait (%p3218_p2), %s522_s18, 256  }
  0xeb   : > { %2485 = vsyncadd (%p3218_p2), %s522_s18, 4294967040  ;;  %s534_s11 = scalar_lea.vmem [#allocation7], %s2905_s4  ;;  %s540_s12 = scalar_lea.sflag [#allocation9], %s521_s16 }
  0xec   : > { %s543_s19 = scalar_lea.vmem [#allocation8], %s2905_s4 }
  0xed   : > { %2487 = dma.done.wait (%p3218_p2), %s540_s12, 128  }
  0xee   : > { %2489 = vsyncadd (%p3218_p2), %s540_s12, 4294967168  ;;  %p3219_p12 = scmp.eq.s32.totalorder %s2634_s29, 0 }
  0xf0   : > { %2491 = dma.done.wait (%p3219_p12), [#allocation9], 512   ;;  %p3220_p4 = pmov %p3219_p12 }
  0xf2   : > { %2493 = vsyncadd (%p3220_p4), [#allocation9], 4294966784  ;;  %p3221_p0 = pmov %p3220_p4 }
  0xf4   : > { %2495 = dma.done.wait (%p3221_p0), [#allocation12], 1024   ;;  %p3222_p8 = pmov %p3221_p0 }
  0xf5   : > { %v2531_v0 = vmov 0.0|0.0   ;;  %vm2532_vm0 = vmmov 0   ;;  %v2533_v1 = vmov 0.0   ;;  %v618_v2 = vld [vmem:[#allocation10] sm:$0xff]  ;;  %v619_v3 = vld [vmem:[#allocation10 + $0x8] sm:$0xff]  ;;  %v620_v4 = vld [vmem:[#allocation10 + $0x10] sm:$0xff] }
  0xf6   : > { %2497 = vsyncadd (%p3222_p8), [#allocation12], 4294966272  ;;  %2053 = vmatprep.subr.bf16.mxu0 %v2531_v0  ;;  %1977 = vmatprep.mubr.msk.f32.mxu0 %vm2532_vm0, %v2533_v1  ;;  %v2054_v5 = vpack.c.bf16 %v619_v3, %v618_v2  ;;  %v621_v6 = vld [vmem:[#allocation10 + $0x18] sm:$0xff]  ;;  %v626_v8 = vld [vmem:[#allocation13] sm:$0xff]  ;;  %vm642_vm1 = vcmask 261120   ;;  %vm881_vm2 = vcmask 64512  }
  0xf7   : > { %2059 = vmatprep.subr.bf16.mxu1 %v2531_v0  ;;  %1988 = vmatprep.mubr.msk.f32.mxu1 %vm2532_vm0, %v2533_v1  ;;  %v2057_v7 = vpack.c.bf16 %v621_v6, %v620_v4  ;;  %v622_v9 = vld [vmem:[#allocation11] sm:$0xff]  ;;  %v623_v10 = vld [vmem:[#allocation11 + $0x8] sm:$0xff]  ;;  %v624_v13 = vld [vmem:[#allocation11 + $0x10] sm:$0xff]  ;;  %s2534_s1 = smov 120   ;;  %s2535_s10 = smov 112   ;;  %vm1562_vm4 = vcmask 130048  }
  0xf8   : > { %2055 = vmatpush3.bf16.msra.mxu0 %v2054_v5  ;;  %v627_v11 = vld [vmem:[#allocation13 + $0x8] sm:$0xff]  ;;  %v2060_v12 = vpack.c.bf16 %v623_v10, %v622_v9  ;;  %v625_v14 = vld [vmem:[#allocation11 + $0x18] sm:$0xff]  ;;  %v628_v18 = vld [vmem:[#allocation13 + $0x10] sm:$0xff]  ;;  %s2536_s21 = smov 104   ;;  %s1901_s30 = sshll.u32 %s2902_s6, 5  ;;  %vm1564_vm5 = vcmask 195584  }
  0xf9   : > { %2056 = vmatprep.subr.bf16.mxu0 %v2531_v0  ;;  %v2063_v15 = vpack.c.bf16 %v625_v14, %v624_v13  ;;  %v634_v16 = vld [vmem:[%s516_s24] sm:$0xff]  ;;  %v2066_v17 = vpack.c.bf16 %v627_v11, %v626_v8  ;;  %v629_v19 = vld [vmem:[#allocation13 + $0x18] sm:$0xff]  ;;  %s3000_s20 = scalar_lea.vmem [#allocation15], %s1901_s30  ;;  %s3223_s18 = sld [smem:[#allocation32_spill]] }
  0xfa   : > { %2061 = vmatpush3.bf16.msra.mxu1 %v2060_v12  ;;  %v2069_v20 = vpack.c.bf16 %v629_v19, %v628_v18  ;;  %v797_v21 = vld [vmem:[%s534_s11] sm:$0xff]  ;;  %v716_v22 = vld [vmem:[%s525_s15] sm:$0xff]  ;;  %s2538_s13 = smov 16   ;;  %s2539_s22 = smov 24  }
  0xfb   : > { %2062 = vmatprep.subr.bf16.mxu1 %v2531_v0  ;;  %v1902_v23 = vld [vmem:[%s3153_s5] ss:$0 sm:$0xff]  ;;  %v879_v36 = vld [vmem:[%s543_s19] sm:$0xff]  ;;  %s1679_s23 = sshll.u32 %s3000_s20, 4  ;;  %s3225_s24 = sld [smem:[#allocation35_spill]]  ;;  %s3068_s23 = int_to_ptr.vmem [resolvable:$true] %s1679_s23 }
  0xfc   : > { %2058 = vmatpush3.bf16.msra.mxu0 %v2057_v7  ;;  %v1906_v27 = vld [vmem:[%s3157_s9] ss:$0 sm:$0xff]  ;;  %vm880_vm3 = vcmp.eq.f32.partialorder %v879_v36, 0.0  ;;  %s1653_s15 = scalar_lea.sflag [#allocation16], %s2902_s6  ;;  %s2406_s11 = scalar_lea.vmem %s3068_s23, 512 }
  0xfd   : > { %2065 = vmatprep.subr.bf16.mxu0 %v2531_v0  ;;  %v1904_v32 = vld [vmem:[%s3155_s7] ss:$0 sm:$0xff]  ;;  %p2407_p7 = scmp.ne.s32.totalorder %s3068_s23, %s2406_s11  ;;  %s2540_s12 = smov [#allocation15]  }
  0xfe   : > { %2064 = vmatpush3.bf16.msra.mxu1 %v2063_v15  ;;  %s2410_s19 = sshll.u32 %s2540_s12, 4  ;;  %s2411_s19 = int_to_ptr.vmem [resolvable:$false] %s2410_s19 }
  0xff   : > { %1978 = vmatmul.mubr.msk.f32.vlgmr.msra.gmra.mrb[0].mxu0 %vm642_vm1, %v634_v16  ;;  %2002 = vmatprep.subr.mxu1 %v2533_v1  ;;  %p2413_p13 = scmp.lt.s32.totalorder %s3068_s23, %s2411_s19 }
 0x100   : > { %2067 = vmatpush3.bf16.msra.mxu0 %v2066_v17  ;;  %1999 = vmatprep.mubr.msk.f32.mxu0 %vm2532_vm0, %v2533_v1 }
 0x101   : > { %2068 = vmatprep.subr.bf16.mxu0 %v2531_v0  ;;  %1989 = vmatmul.mubr.msk.f32.vlgmr.msra.gmra.mrb[0].mxu1 %vm642_vm1, %v716_v22 }
 0x102   : > { %2004 = vmatprep.mubr.msk.f32.mxu1 %vm2532_vm0, %v2533_v1 }
 0x104   : > { %2070 = vmatpush3.bf16.msra.mxu0 %v2069_v20 }
 0x105   : > { %2022 = vmatprep.subr.mxu0 %v2533_v1 }
 0x107   : > { %2000 = vmatmul.mubr.msk.f32.vlgmr.msra.gmra.mrb[2].mxu0 %vm642_vm1, %v797_v21 }
 0x108   : > { %2024 = vmatprep.mubr.msk.f32.mxu0 %vm2532_vm0, %v2533_v1 }
 0x1d2   : > { %v712_v24 = vpop.f32.mrb[0].mxu0 }
 0x1d3   : > { %v713_v25 = vadd.f32 %v1902_v23, %v712_v24  ;;  %v1979_v26 = vpop.f32.mrb[1].mxu0 }
 0x1d4   : > { %v793_v33 = vpop.f32.mrb[0].mxu1 }
 0x1d5   : > { %1046 = vrot.lane.b32.xlu1 %v713_v25, %s2534_s1  ;;  %2003 = vmatpush3.xpose.msk.msra.mxu1 %vm881_vm2, %v713_v25  ;;  %v2979_v34 = vadd.f32 %v1904_v32, %v793_v33  ;;  %v1990_v35 = vpop.f32.mrb[1].mxu1 }
 0x1d6   : > { %2007 = vmatprep.subr.mxu1 %v2533_v1  ;;  %v631_v35 = vld [vmem:[%s3223_s18 + $0x8] sm:$0xff] }
 0x1da   : > { %v874_v28 = vpop.f32.mrb[2].mxu0 }
 0x1db   : > { %v875_v29 = vadd.f32 %v1906_v27, %v874_v28  ;;  %v2001_v30 = vpop.f32.mrb[3].mxu0 }
 0x1dd   : > { %v878_v31 = vmul.f32 0.35355338, %v875_v29 }
 0x1df   : > { %1044 = vrot.lane.b32.xlu1 %v878_v31, %s2534_s1  ;;  %2005 = vmatmul.mubr.msk.f32.vlgmr.msra.gmra.mrb[2].mxu1 %vm881_vm2, %v878_v31 }
 0x1e0   : > { %2009 = vmatprep.mubr.msk.f32.mxu1 %vm2532_vm0, %v2533_v1  ;;  %2008 = vmatpush3.msra.mxu1 %v2979_v34 }
 0x1e1   : > { %2012 = vmatprep.subr.mxu1 %v2533_v1 }
 0x1e3   : > { %1213 = vrot.lane.b32.xlu1 %v878_v31, %s2535_s10 }
 0x1e7   : > { %1383 = vrot.lane.b32.xlu1 %v713_v25, %s2536_s21 }
 0x1eb   : > { %1381 = vrot.lane.b32.xlu1 %v878_v31, %s2536_s21 }
 0x247   : > { %v1047_v46 = vpop.permute.xlu1 %1046 }
 0x251   : > { %v1045_v47 = vpop.permute.xlu1 %1044 }
 0x255   : > { %v1214_v48 = vpop.permute.xlu1 %1213 }
 0x259   : > { %v1384_v51 = vpop.permute.xlu1 %1383 }
 0x25d   : > { %v1382_v53 = vpop.permute.xlu1 %1381 }
 0x2b2   : > { %v954_v37 = vpop.f32.mrb[2].mxu1 }
 0x2b3   : > { %v958_v38 = vsel %vm880_vm3, -3.4028235e+38, %v954_v37  ;;  %v2006_v39 = vpop.f32.mrb[3].mxu1  ;;  %v632_v37 = vld [vmem:[%s3223_s18 + $0x10] sm:$0xff] }
 0x2b4   : > { %v959_v40 = vsel %vm881_vm2, %v958_v38, -inf }
 0x2b5   : > { %960 = vmax.xlane.f32.xlu0 %v959_v40 }
 0x342   : > { %v961_v41 = vpop.xlane.xlu0 %960 }
 0x343   : > { %v962_v42 = vsub.f32 %v958_v38, %v961_v41 }
 0x345   : > { %v963_v43 = vmul.f32 1.442695, %v962_v42 }
 0x347   : > { %2186 = vpow2.f32 %v963_v43 }
 0x351   : > { %v2187_v44 = vpop.eup %2186 }
 0x352   : > { %v965_v45 = vsel %vm881_vm2, %v2187_v44, 0.0 }
 0x353   : > { %966 = vadd.xlane.f32.xlu0 %v965_v45 }
 0x369   : > { %1215 = vrot.lane.b32.xlu0 %v713_v25, %s2535_s10 }
 0x3e0   : > { %v967_v49 = vpop.xlane.xlu0 %966 }
 0x3e1   : > { %2188 = vrcp.f32 %v967_v49 }
 0x3e4   : > { %v1216_v50 = vpop.permute.xlu0 %1215 }
 0x3e5   : > { %2023 = vmatpush3.xpose.msk.msra.mxu0 %vm881_vm2, %v1216_v50 }
 0x3e6   : > { %2032 = vmatprep.subr.mxu0 %v2533_v1 }
 0x3e8   : > { %2025 = vmatmul.mubr.msk.f32.vlgmr.msra.gmra.mrb[4].mxu0 %vm881_vm2, %v1214_v48 }
 0x3e9   : > { %2033 = vmatpush3.xpose.msk.msra.mxu0 %vm881_vm2, %v1384_v51  ;;  %2034 = vmatprep.mubr.msk.f32.mxu0 %vm2532_vm0, %v2533_v1 }
 0x3ea   : > { %2071 = vmatprep.subr.bf16.mxu0 %v2531_v0 }
 0x3eb   : > { %v2189_v52 = vpop.eup %2188 }
 0x3ec   : > { %v969_v54 = vmul.f32 %v2189_v52, %v2187_v44  ;;  %2035 = vmatmul.mubr.msk.f32.vlgmr.msra.gmra.mrb[6].mxu0 %vm881_vm2, %v1382_v53 }
 0x3ed   : > { %2050 = vmatprep.mubr.msk.f32.mxu0 %vm2532_vm0, %v2533_v1 }
 0x3ee   : > { %970 = vst.msk [vmem:[%s3000_s20] sm:$0xff] %vm881_vm2, %v969_v54  ;;  %2010 = vmatmul.mubr.msk.f32.vlgmr.msra.gmra.mrb[4].mxu1 %vm881_vm2, %v969_v54 }
 0x3ef   : > { %2013 = vmatpush3.xpose.msk.msra.mxu1 %vm881_vm2, %v1047_v46  ;;  %2014 = vmatprep.mubr.msk.f32.mxu1 %vm2532_vm0, %v2533_v1 }
 0x3f0   : > { %2017 = vmatprep.subr.mxu1 %v2533_v1 }
 0x3f2   : > { %2015 = vmatmul.mubr.msk.f32.vlgmr.msra.gmra.mrb[6].mxu1 %vm881_vm2, %v1045_v47 }
 0x3f3   : > { %2019 = vmatprep.mubr.msk.f32.mxu1 %vm2532_vm0, %v2533_v1 }
 0x4bb   : > { %v1287_v55 = vpop.f32.mrb[4].mxu0 }
 0x4bc   : > { %v1291_v56 = vsel %vm880_vm3, -3.4028235e+38, %v1287_v55  ;;  %v2026_v57 = vpop.f32.mrb[5].mxu0 }
 0x4bd   : > { %v1292_v58 = vsel %vm881_vm2, %v1291_v56, -inf }
 0x4be   : > { %1293 = vmax.xlane.f32.xlu0 %v1292_v58 }
 0x4bf   : > { %v1455_v59 = vpop.f32.mrb[6].mxu0 }
 0x4c0   : > { %v2036_v60 = vpop.f32.mrb[7].mxu0  ;;  %v1459_v5 = vsel %vm880_vm3, -3.4028235e+38, %v1455_v59 }
 0x4c1   : > { %v3014_v61 = vpop.f32.mrb[4].mxu1  ;;  %v1460_v6 = vsel %vm881_vm2, %v1459_v5, -inf }
 0x4c2   : > { %v2011_v62 = vpop.f32.mrb[5].mxu1 }
 0x4c5   : > { %v1118_v63 = vpop.f32.mrb[6].mxu1 }
 0x4c6   : > { %v1122_v2 = vsel %vm880_vm3, -3.4028235e+38, %v1118_v63  ;;  %v2016_v3 = vpop.f32.mrb[7].mxu1 }
 0x4c7   : > { %v1123_v4 = vsel %vm881_vm2, %v1122_v2, -inf }
 0x4c8   : > { %1124 = vmax.xlane.f32.xlu1 %v1123_v4 }
 0x4cc   : > { %1461 = vmax.xlane.f32.xlu1 %v1460_v6 }
 0x54b   : > { %v1294_v7 = vpop.xlane.xlu0 %1293 }
 0x54c   : > { %v1295_v8 = vsub.f32 %v1291_v56, %v1294_v7 }
 0x54e   : > { %v1296_v9 = vmul.f32 1.442695, %v1295_v8 }
 0x550   : > { %2190 = vpow2.f32 %v1296_v9 }
 0x555   : > { %v1125_v10 = vpop.xlane.xlu1 %1124 }
 0x556   : > { %v1126_v18 = vsub.f32 %v1122_v2, %v1125_v10 }
 0x558   : > { %v1127_v19 = vmul.f32 1.442695, %v1126_v18 }
 0x559   : > { %v1462_v11 = vpop.xlane.xlu1 %1461 }
 0x55a   : > { %v2191_v12 = vpop.eup %2190  ;;  %v1463_v13 = vsub.f32 %v1459_v5, %v1462_v11 }
 0x55b   : > { %v1298_v14 = vsel %vm881_vm2, %v2191_v12, 0.0 }
 0x55c   : > { %v1464_v15 = vmul.f32 1.442695, %v1463_v13  ;;  %1299 = vadd.xlane.f32.xlu0 %v1298_v14 }
 0x55e   : > { %2192 = vpow2.f32 %v1464_v15 }
 0x55f   : > { %2194 = vpow2.f32 %v1127_v19 }
 0x568   : > { %v2193_v16 = vpop.eup %2192 }
 0x569   : > { %v1466_v17 = vsel %vm881_vm2, %v2193_v16, 0.0  ;;  %v2195_v20 = vpop.eup %2194 }
 0x56a   : > { %1467 = vadd.xlane.f32.xlu1 %v1466_v17  ;;  %v1129_v21 = vsel %vm881_vm2, %v2195_v20, 0.0 }
 0x572   : > { %1137 = vrot.lane.b32.xlu0 %v2979_v34, %s2534_s1  ;;  %s2537_s1 = smov 8  }
 0x57b   : > { %1305 = vrot.lane.b32.xlu1 %v2979_v34, %s2535_s10  ;;  %s3224_s10 = sld [smem:[#allocation27_spill]] }
 0x581   : > { %p3226_p11 = scmp.ne.s32.totalorder %s3224_s10, 0 }
 0x583   : > { %p2408_p10 = pnand %p2407_p7, %p3226_p11 }
 0x585   : > { %p2409_p1 = pneg %p2408_p10 }
 0x59f   : > { %1130 = vadd.xlane.f32.xlu1 %v1129_v21 }
 0x5b0   : > { %1473 = vrot.lane.b32.xlu1 %v2979_v34, %s2536_s21  ;;  %v630_v34 = vld [vmem:[%s3223_s18] sm:$0xff]  ;;  %s1932_s21 = sshll.u32 %s2634_s29, 9 }
 0x5b1   : > { %v2072_v36 = vpack.c.bf16 %v631_v35, %v630_v34  ;;  %s3066_s16 = scalar_lea.hbm %s3225_s24, %s1932_s21 }
 0x5b3   : > { %2073 = vmatpush3.bf16.msra.mxu0 %v2072_v36 }
 0x5b4   : > { %2074 = vmatprep.subr.bf16.mxu0 %v2531_v0 }
 0x5e9   : > { %v1300_v22 = vpop.xlane.xlu0 %1299 }
 0x5ea   : > { %2196 = vrcp.f32 %v1300_v22 }
 0x5ed   : > { %v1138_v23 = vpop.permute.xlu0 %1137 }
 0x5ee   : > { %2018 = vmatpush3.msra.mxu1 %v1138_v23 }
 0x5ef   : > { %2027 = vmatprep.subr.mxu1 %v2533_v1 }
 0x5f4   : > { %v2197_v24 = vpop.eup %2196 }
 0x5f5   : > { %v1302_v25 = vmul.f32 %v2197_v24, %v2191_v12 }
 0x5f7   : > { %1917 = vst.msk [vmem:[%s3000_s20 + $0x10] sm:$0xff] %vm881_vm2, %v1302_v25  ;;  %v1468_v26 = vpop.xlane.xlu1 %1467 }
 0x5f8   : > { %2198 = vrcp.f32 %v1468_v26 }
 0x5fb   : > { %v1306_v29 = vpop.permute.xlu1 %1305 }
 0x602   : > { %v2199_v27 = vpop.eup %2198 }
 0x603   : > { %v1470_v28 = vmul.f32 %v2199_v27, %v2193_v16 }
 0x605   : > { %1921 = vst.msk [vmem:[%s3000_s20 + $0x18] sm:$0xff] %vm881_vm2, %v1470_v28 }
 0x62c   : > { %v1131_v30 = vpop.xlane.xlu1 %1130 }
 0x62d   : > { %2200 = vrcp.f32 %v1131_v30 }
 0x630   : > { %v1474_v33 = vpop.permute.xlu1 %1473 }
 0x637   : > { %v2201_v31 = vpop.eup %2200 }
 0x638   : > { %v1133_v32 = vmul.f32 %v2201_v31, %v2195_v20 }
 0x63a   : > { %1913 = vst.msk [vmem:[%s3000_s20 + $0x8] sm:$0xff] %vm881_vm2, %v1133_v32  ;;  %2020 = vmatmul.mubr.msk.f32.vlgmr.msra.gmra.mrb[8].mxu1 %vm881_vm2, %v1133_v32  ;;  %s2412_s20 = scalar_lea.vmem %s2411_s19, 1024 }
 0x63b   : > { %2028 = vmatpush3.msra.mxu1 %v1306_v29  ;;  %2029 = vmatprep.mubr.msk.f32.mxu1 %vm2532_vm0, %v2533_v1  ;;  %p2414_p9 = scmp.lt.s32.totalorder %s2412_s20, %s2406_s11 }
 0x63c   : > { %2037 = vmatprep.subr.mxu1 %v2533_v1 }
 0x63d   : > { %p2415_p3 = por %p2414_p9, %p2413_p13 }
 0x63e   : > { %2030 = vmatmul.mubr.msk.f32.vlgmr.msra.gmra.mrb[10].mxu1 %vm881_vm2, %v1302_v25 }
 0x63f   : > { %2038 = vmatpush3.msra.mxu1 %v1474_v33  ;;  %2039 = vmatprep.mubr.msk.f32.mxu1 %vm2532_vm0, %v2533_v1  ;;  %v633_v1 = vld [vmem:[%s3223_s18 + $0x18] sm:$0xff]  ;;  %p2416_p5 = pnand %p2415_p3, %p2409_p1 }
 0x640   : > { %v2075_v38 = vpack.c.bf16 %v633_v1, %v632_v37 }
 0x642   : > { %2040 = vmatmul.mubr.msk.f32.vlgmr.msra.gmra.mrb[12].mxu1 %vm881_vm2, %v1470_v28  ;;  %2076 = vmatpush3.bf16.msra.mxu0 %v2075_v38 }
 0x70d   : > { %v1209_v39 = vpop.f32.mrb[8].mxu1 }
 0x70e   : > { %1550 = vrot.lane.b32.xlu0 %v1209_v39, %s2537_s1  ;;  %v2021_v40 = vpop.f32.mrb[9].mxu1 }
 0x711   : > { %v1377_v41 = vpop.f32.mrb[10].mxu1 }
 0x712   : > { %1554 = vrot.lane.b32.xlu1 %v1377_v41, %s2538_s13  ;;  %v2031_v0 = vpop.f32.mrb[11].mxu1 }
 0x715   : > { %v1545_v42 = vpop.f32.mrb[12].mxu1 }
 0x716   : > { %1558 = vrot.lane.b32.xlu0 %v1545_v42, %s2539_s22  ;;  %v2041_v43 = vpop.f32.mrb[13].mxu1 }
 0x780   : > { %v1551_v44 = vpop.permute.xlu0 %1550 }
 0x781   : > { %v1561_v46 = vsel %vm881_vm2, %v3014_v61, %v1551_v44 }
 0x784   : > { %v1555_v45 = vpop.permute.xlu1 %1554 }
 0x785   : > { %v1563_v47 = vsel %vm1562_vm4, %v1561_v46, %v1555_v45 }
 0x788   : > { %v1559_v48 = vpop.permute.xlu0 %1558 }
 0x789   : > { %v1565_v49 = vsel %vm1564_vm5, %v1563_v47, %v1559_v48 }
 0x78a   : > { %2051 = vmatmul.mubr.msk.f32.vlgmr.msra.gmra.mrb[8].mxu0 %vm642_vm1, %v1565_v49 }
 0x78b   : > { %2419 = shalt.err (!%p2416_p5)
}
 0x78c   : > { %s2420_s14 = scalar_lea.hbm %s3066_s16, 512  ;;  %s2424_s22 = scalar_lea.hbm %s3225_s24, 1024 }
 0x78d   : > { %p2421_p6 = scmp.ne.s32.totalorder %s3066_s16, %s2420_s14  ;;  %p2425_p4 = scmp.lt.u32.totalorder %s3066_s16, %s3225_s24 }
 0x78e   : > { %p2426_p0 = scmp.lt.u32.totalorder %s2424_s22, %s2420_s14  ;;  %p2428_p7 = scmp.lt.u32.totalorder %s2420_s14, %s3066_s16 }
 0x78f   : > { %p2422_p2 = pnand %p2421_p6, %p3226_p11 }
 0x790   : > { %p2427_p8 = por %p2426_p0, %p2425_p4 }
 0x791   : > { %p2423_p12 = pneg %p2422_p2 }
 0x792   : > { %p2429_p10 = por %p2428_p7, %p2427_p8 }
 0x794   : > { %p2430_p1 = pnand %p2429_p10, %p2423_p12 }
 0x796   : > { %2433 = shalt.err (!%p2430_p1)
}
 0x797   : > { %s2541_s30 = smov 128   ;;  %s3227_s19 = sld [smem:[#allocation33_spill]] }
 0x798   : > { %2098 = dma.vmem_to_hbm [thread:$0]  (%p3226_p11), %s3068_s23, 512, %s3066_s16, %s1653_s15, %s2541_s30, %s2541_s30, %s2537_s1  }
 0x799   : > { %s1927_s20 = sshll.u32 %s2634_s29, 7  ;;  %s610_s14 = scalar_lea.vmem [#allocation14], %s2905_s4 }
 0x79a   : > { %s1666_s25 = sshll.u32 %s610_s14, 4  ;;  %s3228_s21 = sld [smem:[#allocation34_spill]]  ;;  %s3105_s25 = int_to_ptr.vmem [resolvable:$true] %s1666_s25 }
 0x79b   : > { %s1648_s1 = scalar_lea.sflag [#allocation4], %s2902_s6  ;;  %s2434_s23 = scalar_lea.vmem %s3105_s25, 128 }
 0x79c   : > { %p2435_p13 = scmp.ne.s32.totalorder %s3105_s25, %s2434_s23  ;;  %s2542_s29 = smov [#allocation14]  }
 0x79d   : > { %v1923_v50 = vld [vmem:[%s3227_s19] ss:$0 sm:$0xff]  ;;  %s2438_s4 = sshll.u32 %s2542_s29, 4  ;;  %s2439_s4 = int_to_ptr.vmem [resolvable:$false] %s2438_s4 }
 0x79e   : > { %p2436_p9 = pnand %p2435_p13, %p3226_p11  ;;  %s2440_s16 = scalar_lea.vmem %s2439_s4, 256 }
 0x79f   : > { %p2441_p5 = scmp.lt.s32.totalorder %s3105_s25, %s2439_s4  ;;  %p2442_p6 = scmp.lt.s32.totalorder %s2440_s16, %s2434_s23 }
 0x7a0   : > { %s3103_s17 = scalar_lea.hbm %s3228_s21, %s1927_s20  ;;  %p2437_p3 = pneg %p2436_p9 }
 0x7a1   : > { %p2443_p2 = por %p2442_p6, %p2441_p5 }
 0x7a3   : > { %p2444_p12 = pnand %p2443_p2, %p2437_p3 }
 0x85d   : > { %v1642_v51 = vpop.f32.mrb[8].mxu0 }
 0x85e   : > { %v1643_v52 = vadd.f32 %v1923_v50, %v1642_v51  ;;  %v2052_v53 = vpop.f32.mrb[9].mxu0 }
 0x860   : > { %1646 = vst.msk [vmem:[%s610_s14] sm:$0xff] %vm642_vm1, %v1643_v52 }
 0x861   : > { %2447 = shalt.err (!%p2444_p12)
}
 0x862   : > { %s2448_s6 = scalar_lea.hbm %s3103_s17, 128  ;;  %s2452_s11 = scalar_lea.hbm %s3228_s21, 256 }
 0x863   : > { %p2449_p4 = scmp.ne.s32.totalorder %s3103_s17, %s2448_s6  ;;  %p2453_p7 = scmp.lt.u32.totalorder %s3103_s17, %s3228_s21 }
 0x864   : > { %p2454_p10 = scmp.lt.u32.totalorder %s2452_s11, %s2448_s6  ;;  %p2456_p13 = scmp.lt.u32.totalorder %s2448_s6, %s3103_s17 }
 0x865   : > { %p2450_p0 = pnand %p2449_p4, %p3226_p11 }
 0x866   : > { %p2455_p1 = por %p2454_p10, %p2453_p7 }
 0x867   : > { %p2451_p8 = pneg %p2450_p0 }
 0x868   : > { %p2457_p9 = por %p2456_p13, %p2455_p1 }
 0x86a   : > { %p2458_p3 = pnand %p2457_p9, %p2451_p8 }
 0x86c   : > { %2461 = shalt.err (!%p2458_p3)
}
 0x86d   : > { %2097 = dma.vmem_to_hbm [thread:$0]  (%p3226_p11), %s3105_s25, 128, %s3103_s17, %s1648_s1  }
 0x86e PF: > { %s3229_s20 = sld [smem:[#allocation24_spill]]  ;;  %s3230_s14 = sld [smem:[#allocation25_spill]] }
 0x86f   : > { %p3232_p6 = scmp.ge.s32.totalorder %s2520_s28, 2 }
 0x874   : > { %s1694_s13 = sand.u32 1, %s3229_s20   ;;  %p3231_p5 = scmp.ne.s32.totalorder %s3230_s14, 0 }
 0x875   : > { %s1695_s22 = scalar_lea.sflag [#allocation4], %s1694_s13 }
 0x876   : > { %p2125_p2 = pnand %p3232_p6, %p3231_p5 }
 0x878   : > { %2499 = dma.done.wait (!%p2125_p2), %s1695_s22, 128  }
 0x879   : > { %2501 = vsyncadd (!%p2125_p2), %s1695_s22, 4294967168  ;;  %s1704_s23 = scalar_lea.sflag [#allocation16], %s1694_s13 }
 0x87a   : > { %2503 = dma.done.wait (!%p2125_p2), %s1704_s23, 512  }
 0x87b   : > { %2505 = vsyncadd (!%p2125_p2), %s1704_s23, 4294966784  ;;  %s3233_s28 = sld [smem:[#allocation26_spill]]  ;;  %s3234_s10 = sld [smem:[#allocation28_spill]] }
 0x87c   : > { %s3235_s25 = smov %s2512_s26  ;;  %s3236_s26 = smov %s2516_s27 }
 0x881   : > { %p37_p11 = scmp.ge.s32.totalorder %s3233_s28, 4   ;;  %s3237_s27 = smov %s3234_s10 }
 0x883   :  { %39 = sbr.rel (!%p37_p11) target bundleno = 20 (0x14), region = 182 }
 0x88a   :  { %1709 = vsyncpa [#allocation3], 1 }
 0x88b   :  { %1711 = vsyncpa [#allocation3 + $0x1], 1 }
 0x88c   :  { %1712 = vsyncpa [#allocation6], 1 }
 0x88d   :  { %1714 = vsyncpa [#allocation6 + $0x1], 1 }
 0x88e   :  { %1715 = vsyncpa [#allocation9], 1 }
 0x88f   :  { %1717 = vsyncpa [#allocation9 + $0x1], 1 }
 0x890   :  { %1718 = vsyncpa [#allocation12], 1 }
 0x891   :  { %1719 = vsyncpa [#allocation4], 1 }
 0x892   :  { %1721 = vsyncpa [#allocation4 + $0x1], 1 }
 0x893   :  { %1722 = vsyncpa [#allocation16], 1 }
 0x894   :  { %1724 = vsyncpa [#allocation16 + $0x1], 1 }

</bundles_post_ra>
